<compile_context>
chip_gen: v7x
topology: tpu7x:2x2x1
jax: 0.10.0
libtpu: 0.0.40
codegen_flags: <defaults>
</compile_context>

<pallas_src>
import functools

import jax
import jax.numpy as jnp
from jax.experimental import pallas as pl
from jax.experimental.pallas import tpu as pltpu


def _block_kernel(x_ref, g1_ref, b1_ref, wqkv_ref, bqkv_ref, wproj_ref, bproj_ref,
                  g2_ref, b2_ref, wfc1_ref, bfc1_ref, wfc2_ref, bfc2_ref,
                  out_ref, *, n_heads, seq_len, block_b):
    f32, bf16 = jnp.float32, jnp.bfloat16
    eps = 1e-6
    m, d = x_ref.shape                     # m = block_b * t_pad
    t_pad = m // block_b
    hd = d // n_heads

    def layer_norm(v, g_ref, beta_ref):
        # two-pass variance (avoids E[x^2]-mu^2 cancellation in deep residual streams)
        mu = jnp.mean(v, axis=-1, keepdims=True)
        c = v - mu
        var = jnp.mean(c * c, axis=-1, keepdims=True)
        return c * jax.lax.rsqrt(var + eps) * g_ref[...] + beta_ref[...]

    x = x_ref[...]                                                  # (m, d) f32

    # ---- attention branch: x + proj(MHSA(LN1(x))) ----
    xn = layer_norm(x, g1_ref, b1_ref).astype(bf16)
    # softmax scale is pre-folded into the Q columns of wqkv / bqkv (wrapper side)
    qkv = jnp.dot(xn, wqkv_ref[...], preferred_element_type=f32) + bqkv_ref[...]
    # leading-dim split only (t_pad % 8 == 0) -> free reinterpretation, then pack to bf16
    qkv = qkv.reshape(block_b, t_pad, 3 * d).astype(bf16)           # (block_b, t_pad, 3d)

    # head split: n_heads static lane slices gathered on a new leading batch axis
    # (head-major batch of size n_heads*block_b). No per-sample loop, no stacks.
    def split_heads(off):
        return jnp.concatenate(
            [qkv[:, :, off + h * hd: off + (h + 1) * hd] for h in range(n_heads)],
            axis=0)                                                 # (n_heads*block_b, t_pad, hd)

    qh = split_heads(0)
    kh = split_heads(d)
    vh = split_heads(2 * d)

    # ONE pair of batched attention matmuls over the combined (head, sample) axis.
    s = jnp.einsum('bqd,bkd->bqk', qh, kh, preferred_element_type=f32)
    if seq_len < t_pad:                                             # static check
        kidx = jax.lax.broadcasted_iota(jnp.int32, (1, t_pad, t_pad), 2)
        s = s + jnp.where(kidx < seq_len, 0.0, -1e30).astype(f32)   # mask padded keys
    s = s - jnp.max(s, axis=-1, keepdims=True)
    e = jnp.exp(s)
    p = (e * pl.reciprocal(jnp.sum(e, axis=-1, keepdims=True), approx=True)).astype(bf16)
    ctx = jnp.einsum('bqk,bkd->bqd', p, vh, preferred_element_type=f32)

    # merge heads back onto lanes -> lane-dense (block_b, t_pad, d), feed proj directly
    ctx = jnp.concatenate(
        [ctx[h * block_b:(h + 1) * block_b] for h in range(n_heads)], axis=-1)
    ctx = ctx.reshape(m, d).astype(bf16)

    attn_out = jnp.dot(ctx, wproj_ref[...], preferred_element_type=f32) + bproj_ref[...]
    x1 = x + attn_out

    # ---- MLP branch: x1 + fc2(GELU(fc1(LN2(x1)))) ----
    xn2 = layer_norm(x1, g2_ref, b2_ref).astype(bf16)
    h1 = jnp.dot(xn2, wfc1_ref[...], preferred_element_type=f32) + bfc1_ref[...]
    # tanh-approx GELU: transcendental runs on the EUP slot (f32 math is safe on v5e too)
    h1 = 0.5 * h1 * (1.0 + jnp.tanh(0.7978845608028654 * (h1 + 0.044715 * h1 * h1 * h1)))
    h2 = jnp.dot(h1.astype(bf16), wfc2_ref[...], preferred_element_type=f32) + bfc2_ref[...]

    out_ref[...] = (x1 + h2).astype(out_ref.dtype)


def prepare_block_params(params, n_heads):
    """One-time weight prep (hoisted out of the forward pass): fold the softmax
    scale into the Q columns of Wqkv/bqkv and cast matmul weights to bf16."""
    f32, bf16 = jnp.float32, jnp.bfloat16
    D = params["wproj"].shape[0]
    hd = D // n_heads
    scale = hd ** (-0.5)
    col_scale = jnp.concatenate(
        [jnp.full((D,), scale, f32), jnp.ones((2 * D,), f32)])
    return {
        "g1": params["g1"].astype(f32), "b1": params["b1"].astype(f32),
        "wqkv": (params["wqkv"].astype(f32) * col_scale[None, :]).astype(bf16),
        "bqkv": params["bqkv"].astype(f32) * col_scale[None, :],
        "wproj": params["wproj"].astype(bf16), "bproj": params["bproj"].astype(f32),
        "g2": params["g2"].astype(f32), "b2": params["b2"].astype(f32),
        "wfc1": params["wfc1"].astype(bf16), "bfc1": params["bfc1"].astype(f32),
        "wfc2": params["wfc2"].astype(bf16), "bfc2": params["bfc2"].astype(f32),
    }


def _tpu_budget():
    """(vmem_limit_bytes, target rows per grid step), sized per TPU generation."""
    vmem_cap = 128 * 1024 * 1024
    try:  # capability probe only; fall back to conservative defaults if unavailable
        vmem_cap = int(pltpu.get_tpu_info().vmem_capacity_bytes)
    except Exception:
        pass
    if vmem_cap >= 100 * 1024 * 1024:           # v5e / v6e: 128 MiB VMEM per core
        return 100 * 1024 * 1024, 768
    return int(vmem_cap * 3 // 4), 256          # v7x: 64 MiB per TensorCore -> headroom


def transformer_block(x, prep, n_heads, block_b=None):
    """x: (B, T, D) float32; prep: output of prepare_block_params()."""
    B, T, D = x.shape
    H = prep["wfc1"].shape[1]
    hd = D // n_heads

    vmem_limit, target_m = _tpu_budget()

    # --- wrapper-side shape prep: pad T to a sublane multiple, group samples ---
    t_pad = ((T + 7) // 8) * 8
    if block_b is None:
        block_b = max(1, min(B, pl.cdiv(target_m, t_pad)))
        # keep >= 2 grid steps so the "parallel" axis can split over v7x's 2 TCs
        if pl.cdiv(B, block_b) < 2 and block_b > 1:
            block_b = pl.cdiv(block_b, 2)
    b_pad = pl.cdiv(B, block_b) * block_b
    xp = jnp.pad(x, ((0, b_pad - B), (0, t_pad - T), (0, 0)))
    x_flat = xp.reshape(b_pad * t_pad, D)

    weights = [prep[k] for k in ("g1", "b1", "wqkv", "bqkv", "wproj", "bproj",
                                 "g2", "b2", "wfc1", "bfc1", "wfc2", "bfc2")]

    m_blk = block_b * t_pad
    grid = (b_pad // block_b,)
    x_spec = pl.BlockSpec((m_blk, D), lambda i: (i, 0))
    out_spec = pl.BlockSpec((m_blk, D), lambda i: (i, 0))

    # advisory cost model for the XLA scheduler
    m_total = b_pad * t_pad
    gemm_flops = 2 * m_total * D * (3 * D + D + 2 * H)
    attn_flops = 4 * b_pad * n_heads * t_pad * t_pad * hd
    cost = pl.CostEstimate(
        flops=int(gemm_flops + attn_flops),
        transcendentals=int(b_pad * n_heads * t_pad * t_pad + m_total * H),
        bytes_accessed=int(2 * x_flat.size * 4
                           + sum(int(w.size) * w.dtype.itemsize for w in weights)))

    kernel = functools.partial(_block_kernel, n_heads=n_heads, seq_len=T,
                               block_b=block_b)

    def call(weight_specs):
        return pl.pallas_call(
            kernel,
            out_shape=jax.ShapeDtypeStruct((b_pad * t_pad, D), x.dtype),
            grid=grid,
            in_specs=[x_spec] + weight_specs,
            out_specs=out_spec,
            compiler_params=pltpu.CompilerParams(
                dimension_semantics=("parallel",),
                vmem_limit_bytes=vmem_limit),
            cost_estimate=cost,
        )(x_flat, *weights)

    # primary: whole weights resident in VMEM (single copy, not double-buffered)
    resident = [pl.BlockSpec(memory_space=pltpu.MemorySpace.VMEM) for _ in weights]
    try:
        out_flat = call(resident)
    except (pltpu.LoweringException, NotImplementedError, ValueError, TypeError):
        # fallback for Pallas versions that reject unblocked VMEM operands:
        # pipelined full-array blocks with constant index maps (copied once).
        pipelined = [pl.BlockSpec(w.shape, lambda i, _n=w.ndim: (0,) * _n)
                     for w in weights]
        out_flat = call(pipelined)

    return out_flat.reshape(b_pad, t_pad, D)[:B, :T, :]


def reference_block(x, params, n_heads):
    """Pure-JAX f32 reference mirroring the PyTorch forward pass (erf GELU)."""
    B, T, D = x.shape
    hd = D // n_heads
    scale = hd ** (-0.5)
    eps = 1e-6

    def ln(v, g, b):
        mu = jnp.mean(v, axis=-1, keepdims=True)
        var = jnp.mean((v - mu) ** 2, axis=-1, keepdims=True)
        return (v - mu) / jnp.sqrt(var + eps) * g + b

    xn = ln(x, params["g1"][0], params["b1"][0])
    qkv = xn @ params["wqkv"] + params["bqkv"][0]                       # (B,T,3D)
    qkv = qkv.reshape(B, T, 3, n_heads, hd).transpose(2, 0, 3, 1, 4)    # (3,B,H,T,hd)
    q, k, v = qkv[0], qkv[1], qkv[2]
    dp = jnp.einsum("bhqd,bhkd->bhqk", q, k) * scale
    attn = jax.nn.softmax(dp, axis=-1)
    wa = jnp.einsum("bhqk,bhkd->bhqd", attn, v)
    wa = wa.transpose(0, 2, 1, 3).reshape(B, T, D)
    x1 = x + (wa @ params["wproj"] + params["bproj"][0])

    xn2 = ln(x1, params["g2"][0], params["b2"][0])
    h1 = xn2 @ params["wfc1"] + params["bfc1"][0]
    h1 = 0.5 * h1 * (1.0 + jax.lax.erf(h1 * 0.7071067811865476))
    h2 = h1 @ params["wfc2"] + params["bfc2"][0]
    return x1 + h2


if __name__ == "__main__":
    B, T, D = 2, 9, 32          # T = n_patches + 1 (odd -> exercises T padding + key mask)
    n_heads = 4
    mlp_ratio = 4.0
    H = int(D * mlp_ratio)
    # NOTE: this is a tiny correctness config; profile/tune with real ViT dims
    # (D>=768, H>=3072) where all ops are lane-dense and the MXU is actually fed.

    key = jax.random.PRNGKey(0)
    ks = jax.random.split(key, 13)
    params = {
        "g1": 1.0 + 0.02 * jax.random.normal(ks[0], (1, D), jnp.float32),
        "b1": 0.02 * jax.random.normal(ks[1], (1, D), jnp.float32),
        "wqkv": 0.05 * jax.random.normal(ks[2], (D, 3 * D), jnp.float32),
        "bqkv": 0.02 * jax.random.normal(ks[3], (1, 3 * D), jnp.float32),
        "wproj": 0.05 * jax.random.normal(ks[4], (D, D), jnp.float32),
        "bproj": 0.02 * jax.random.normal(ks[5], (1, D), jnp.float32),
        "g2": 1.0 + 0.02 * jax.random.normal(ks[6], (1, D), jnp.float32),
        "b2": 0.02 * jax.random.normal(ks[7], (1, D), jnp.float32),
        "wfc1": 0.05 * jax.random.normal(ks[8], (D, H), jnp.float32),
        "bfc1": 0.02 * jax.random.normal(ks[9], (1, H), jnp.float32),
        "wfc2": 0.05 * jax.random.normal(ks[10], (H, D), jnp.float32),
        "bfc2": 0.02 * jax.random.normal(ks[11], (1, D), jnp.float32),
    }
    x = jax.random.normal(ks[12], (B, T, D), jnp.float32)

    prep = prepare_block_params(params, n_heads)     # one-time weight prep
    out = transformer_block(x, prep, n_heads)
    out = jax.block_until_ready(out)

    ref = reference_block(x, params, n_heads)
    assert out.shape == (B, T, D)
    # bf16 matmul operands (f32 accumulation) + tanh-GELU vs. the f32 erf reference
    # => compare with a correspondingly relaxed tolerance.
    assert jnp.allclose(out, ref, atol=2e-2, rtol=2e-2), "mismatch vs reference"

    print("KERNEL_OK")
</pallas_src>

<mosaic_0001>
module attributes {stable_mosaic.version = 11 : i64} {
  func.func @_block_kernel(%arg0: i32, %arg1: memref<16x32xf32, #tpu.memory_space<vmem>>, %arg2: memref<1x32xf32, #tpu.memory_space<vmem>>, %arg3: memref<1x32xf32, #tpu.memory_space<vmem>>, %arg4: memref<32x96xbf16, #tpu.memory_space<vmem>>, %arg5: memref<1x96xf32, #tpu.memory_space<vmem>>, %arg6: memref<32x32xbf16, #tpu.memory_space<vmem>>, %arg7: memref<1x32xf32, #tpu.memory_space<vmem>>, %arg8: memref<1x32xf32, #tpu.memory_space<vmem>>, %arg9: memref<1x32xf32, #tpu.memory_space<vmem>>, %arg10: memref<32x128xbf16, #tpu.memory_space<vmem>>, %arg11: memref<1x128xf32, #tpu.memory_space<vmem>>, %arg12: memref<128x32xbf16, #tpu.memory_space<vmem>>, %arg13: memref<1x32xf32, #tpu.memory_space<vmem>>, %arg14: memref<16x32xf32, #tpu.memory_space<vmem>>) attributes {dimension_semantics = [#tpu.dimension_semantics<parallel>], iteration_bounds = array<i64: 2>, scalar_prefetch = 0 : i64, scratch_operands = 0 : i64, tpu.core_type = #tpu.core_type<tc>, window_params = [{transform_indices = @transform_0, window_bounds = array<i64: 16, 32>}, {pipeline_mode = #tpu.pipeline_mode<synchronous>, transform_indices = @transform_1, window_bounds = array<i64: 1, 32>}, {pipeline_mode = #tpu.pipeline_mode<synchronous>, transform_indices = @transform_2, window_bounds = array<i64: 1, 32>}, {pipeline_mode = #tpu.pipeline_mode<synchronous>, transform_indices = @transform_3, window_bounds = array<i64: 32, 96>}, {pipeline_mode = #tpu.pipeline_mode<synchronous>, transform_indices = @transform_4, window_bounds = array<i64: 1, 96>}, {pipeline_mode = #tpu.pipeline_mode<synchronous>, transform_indices = @transform_5, window_bounds = array<i64: 32, 32>}, {pipeline_mode = #tpu.pipeline_mode<synchronous>, transform_indices = @transform_6, window_bounds = array<i64: 1, 32>}, {pipeline_mode = #tpu.pipeline_mode<synchronous>, transform_indices = @transform_7, window_bounds = array<i64: 1, 32>}, {pipeline_mode = #tpu.pipeline_mode<synchronous>, transform_indices = @transform_8, window_bounds = array<i64: 1, 32>}, {pipeline_mode = #tpu.pipeline_mode<synchronous>, transform_indices = @transform_9, window_bounds = array<i64: 32, 128>}, {pipeline_mode = #tpu.pipeline_mode<synchronous>, transform_indices = @transform_10, window_bounds = array<i64: 1, 128>}, {pipeline_mode = #tpu.pipeline_mode<synchronous>, transform_indices = @transform_11, window_bounds = array<i64: 128, 32>}, {pipeline_mode = #tpu.pipeline_mode<synchronous>, transform_indices = @transform_12, window_bounds = array<i64: 1, 32>}, {transform_indices = @transform_13, window_bounds = array<i64: 16, 32>}]} {
    %c0 = arith.constant 0 : index
    %c0_0 = arith.constant 0 : index
    %0 = vector.load %arg1[%c0, %c0_0] : memref<16x32xf32, #tpu.memory_space<vmem>>, vector<16x32xf32>
    %cst = arith.constant dense<0.000000e+00> : vector<16xf32>
    %1 = vector.multi_reduction <add>, %0, %cst [1] : vector<16x32xf32> to vector<16xf32>
    %2 = vector.shape_cast %1 : vector<16xf32> to vector<16x1xf32>
    %cst_1 = arith.constant 3.200000e+01 : f32
    %3 = vector.broadcast %cst_1 : f32 to vector<16x1xf32>
    %4 = arith.divf %2, %3 : vector<16x1xf32>
    %5 = vector.broadcast %4 : vector<16x1xf32> to vector<16x32xf32>
    %6 = arith.subf %0, %5 : vector<16x32xf32>
    %7 = arith.mulf %6, %6 : vector<16x32xf32>
    %cst_2 = arith.constant dense<0.000000e+00> : vector<16xf32>
    %8 = vector.multi_reduction <add>, %7, %cst_2 [1] : vector<16x32xf32> to vector<16xf32>
    %9 = vector.shape_cast %8 : vector<16xf32> to vector<16x1xf32>
    %cst_3 = arith.constant 3.200000e+01 : f32
    %10 = vector.broadcast %cst_3 : f32 to vector<16x1xf32>
    %11 = arith.divf %9, %10 : vector<16x1xf32>
    %cst_4 = arith.constant 9.99999997E-7 : f32
    %12 = vector.broadcast %cst_4 : f32 to vector<16x1xf32>
    %13 = arith.addf %11, %12 : vector<16x1xf32>
    %14 = math.rsqrt %13 : vector<16x1xf32>
    %15 = vector.broadcast %14 : vector<16x1xf32> to vector<16x32xf32>
    %16 = arith.mulf %6, %15 : vector<16x32xf32>
    %c0_5 = arith.constant 0 : index
    %c0_6 = arith.constant 0 : index
    %17 = vector.load %arg2[%c0_5, %c0_6] : memref<1x32xf32, #tpu.memory_space<vmem>>, vector<1x32xf32>
    %18 = vector.broadcast %17 : vector<1x32xf32> to vector<16x32xf32>
    %19 = arith.mulf %16, %18 : vector<16x32xf32>
    %c0_7 = arith.constant 0 : index
    %c0_8 = arith.constant 0 : index
    %20 = vector.load %arg3[%c0_7, %c0_8] : memref<1x32xf32, #tpu.memory_space<vmem>>, vector<1x32xf32>
    %21 = vector.broadcast %20 : vector<1x32xf32> to vector<16x32xf32>
    %22 = arith.addf %19, %21 : vector<16x32xf32>
    %23 = arith.truncf %22 : vector<16x32xf32> to vector<16x32xbf16>
    %c0_9 = arith.constant 0 : index
    %c0_10 = arith.constant 0 : index
    %24 = vector.load %arg4[%c0_9, %c0_10] : memref<32x96xbf16, #tpu.memory_space<vmem>>, vector<32x96xbf16>
    %cst_11 = arith.constant dense<0.000000e+00> : vector<16x96xf32>
    %25 = tpu.matmul %23, %24, %cst_11 {dimension_numbers = #tpu.dot_dimension_numbers<[1], [0], [0], [1], [0, 0, 1, 1], [], []>} : vector<16x32xbf16>, vector<32x96xbf16>, vector<16x96xf32> -> vector<16x96xf32>
    %c0_12 = arith.constant 0 : index
    %c0_13 = arith.constant 0 : index
    %26 = vector.load %arg5[%c0_12, %c0_13] : memref<1x96xf32, #tpu.memory_space<vmem>>, vector<1x96xf32>
    %27 = vector.broadcast %26 : vector<1x96xf32> to vector<16x96xf32>
    %28 = arith.addf %25, %27 : vector<16x96xf32>
    %29 = vector.shape_cast %28 : vector<16x96xf32> to vector<1x16x96xf32>
    %30 = arith.truncf %29 : vector<1x16x96xf32> to vector<1x16x96xbf16>
    %31 = vector.extract_strided_slice %30 {offsets = [0, 0, 0], sizes = [1, 16, 8], strides = [1, 1, 1]} : vector<1x16x96xbf16> to vector<1x16x8xbf16>
    %32 = vector.extract_strided_slice %30 {offsets = [0, 0, 8], sizes = [1, 16, 8], strides = [1, 1, 1]} : vector<1x16x96xbf16> to vector<1x16x8xbf16>
    %33 = vector.extract_strided_slice %30 {offsets = [0, 0, 16], sizes = [1, 16, 8], strides = [1, 1, 1]} : vector<1x16x96xbf16> to vector<1x16x8xbf16>
    %34 = vector.extract_strided_slice %30 {offsets = [0, 0, 24], sizes = [1, 16, 8], strides = [1, 1, 1]} : vector<1x16x96xbf16> to vector<1x16x8xbf16>
    %35 = tpu.concatenate %31, %32, %33, %34 in 0 : vector<1x16x8xbf16>, vector<1x16x8xbf16>, vector<1x16x8xbf16>, vector<1x16x8xbf16> -> vector<4x16x8xbf16>
    %36 = vector.extract_strided_slice %30 {offsets = [0, 0, 32], sizes = [1, 16, 8], strides = [1, 1, 1]} : vector<1x16x96xbf16> to vector<1x16x8xbf16>
    %37 = vector.extract_strided_slice %30 {offsets = [0, 0, 40], sizes = [1, 16, 8], strides = [1, 1, 1]} : vector<1x16x96xbf16> to vector<1x16x8xbf16>
    %38 = vector.extract_strided_slice %30 {offsets = [0, 0, 48], sizes = [1, 16, 8], strides = [1, 1, 1]} : vector<1x16x96xbf16> to vector<1x16x8xbf16>
    %39 = vector.extract_strided_slice %30 {offsets = [0, 0, 56], sizes = [1, 16, 8], strides = [1, 1, 1]} : vector<1x16x96xbf16> to vector<1x16x8xbf16>
    %40 = tpu.concatenate %36, %37, %38, %39 in 0 : vector<1x16x8xbf16>, vector<1x16x8xbf16>, vector<1x16x8xbf16>, vector<1x16x8xbf16> -> vector<4x16x8xbf16>
    %41 = vector.extract_strided_slice %30 {offsets = [0, 0, 64], sizes = [1, 16, 8], strides = [1, 1, 1]} : vector<1x16x96xbf16> to vector<1x16x8xbf16>
    %42 = vector.extract_strided_slice %30 {offsets = [0, 0, 72], sizes = [1, 16, 8], strides = [1, 1, 1]} : vector<1x16x96xbf16> to vector<1x16x8xbf16>
    %43 = vector.extract_strided_slice %30 {offsets = [0, 0, 80], sizes = [1, 16, 8], strides = [1, 1, 1]} : vector<1x16x96xbf16> to vector<1x16x8xbf16>
    %44 = vector.extract_strided_slice %30 {offsets = [0, 0, 88], sizes = [1, 16, 8], strides = [1, 1, 1]} : vector<1x16x96xbf16> to vector<1x16x8xbf16>
    %45 = tpu.concatenate %41, %42, %43, %44 in 0 : vector<1x16x8xbf16>, vector<1x16x8xbf16>, vector<1x16x8xbf16>, vector<1x16x8xbf16> -> vector<4x16x8xbf16>
    "tpu.trace_start"() <{level = 10 : i32, message = "bqd,bkd->bqk"}> : () -> ()
    %cst_14 = arith.constant dense<0.000000e+00> : vector<4x16x16xf32>
    %46 = tpu.matmul %35, %40, %cst_14 {dimension_numbers = #tpu.dot_dimension_numbers<[2], [2], [1], [1], [0, 0, 0, 1, 1, 1], [0], [0]>} : vector<4x16x8xbf16>, vector<4x16x8xbf16>, vector<4x16x16xf32> -> vector<4x16x16xf32>
    "tpu.trace_stop"() : () -> ()
    %47 = tpu.iota {dimensions = array<i32: 2>} : vector<1x16x16xi32>
    %c9_i32 = arith.constant 9 : i32
    %48 = vector.broadcast %c9_i32 : i32 to vector<1x16x16xi32>
    %49 = arith.cmpi slt, %47, %48 : vector<1x16x16xi32>
    %cst_15 = arith.constant 0.000000e+00 : f32
    %cst_16 = arith.constant -1.000000e+30 : f32
    %50 = vector.broadcast %cst_15 : f32 to vector<1x16x16xf32>
    %51 = vector.broadcast %cst_16 : f32 to vector<1x16x16xf32>
    %52 = arith.select %49, %50, %51 : vector<1x16x16xi1>, vector<1x16x16xf32>
    %53 = vector.broadcast %52 : vector<1x16x16xf32> to vector<4x16x16xf32>
    %54 = arith.addf %46, %53 : vector<4x16x16xf32>
    %cst_17 = arith.constant dense<0xFF800000> : vector<4x16xf32>
    %55 = vector.multi_reduction <maximumf>, %54, %cst_17 [2] : vector<4x16x16xf32> to vector<4x16xf32>
    %56 = vector.shape_cast %55 : vector<4x16xf32> to vector<4x16x1xf32>
    %57 = vector.broadcast %56 : vector<4x16x1xf32> to vector<4x16x16xf32>
    %58 = arith.subf %54, %57 : vector<4x16x16xf32>
    %59 = math.exp %58 : vector<4x16x16xf32>
    %cst_18 = arith.constant dense<0.000000e+00> : vector<4x16xf32>
    %60 = vector.multi_reduction <add>, %59, %cst_18 [2] : vector<4x16x16xf32> to vector<4x16xf32>
    %61 = vector.shape_cast %60 : vector<4x16xf32> to vector<4x16x1xf32>
    %62 = tpu.reciprocal %61 {approx = true} : vector<4x16x1xf32> -> vector<4x16x1xf32>
    %63 = vector.broadcast %62 : vector<4x16x1xf32> to vector<4x16x16xf32>
    %64 = arith.mulf %59, %63 : vector<4x16x16xf32>
    %65 = arith.truncf %64 : vector<4x16x16xf32> to vector<4x16x16xbf16>
    "tpu.trace_start"() <{level = 10 : i32, message = "bqk,bkd->bqd"}> : () -> ()
    %cst_19 = arith.constant dense<0.000000e+00> : vector<4x16x8xf32>
    %66 = tpu.matmul %65, %45, %cst_19 {dimension_numbers = #tpu.dot_dimension_numbers<[2], [1], [1], [2], [0, 0, 0, 1, 1, 2], [0], [0]>} : vector<4x16x16xbf16>, vector<4x16x8xbf16>, vector<4x16x8xf32> -> vector<4x16x8xf32>
    "tpu.trace_stop"() : () -> ()
    %67 = vector.extract_strided_slice %66 {offsets = [0, 0, 0], sizes = [1, 16, 8], strides = [1, 1, 1]} : vector<4x16x8xf32> to vector<1x16x8xf32>
    %68 = vector.extract_strided_slice %66 {offsets = [1, 0, 0], sizes = [1, 16, 8], strides = [1, 1, 1]} : vector<4x16x8xf32> to vector<1x16x8xf32>
    %69 = vector.extract_strided_slice %66 {offsets = [2, 0, 0], sizes = [1, 16, 8], strides = [1, 1, 1]} : vector<4x16x8xf32> to vector<1x16x8xf32>
    %70 = vector.extract_strided_slice %66 {offsets = [3, 0, 0], sizes = [1, 16, 8], strides = [1, 1, 1]} : vector<4x16x8xf32> to vector<1x16x8xf32>
    %71 = tpu.concatenate %67, %68, %69, %70 in 2 : vector<1x16x8xf32>, vector<1x16x8xf32>, vector<1x16x8xf32>, vector<1x16x8xf32> -> vector<1x16x32xf32>
    %72 = vector.shape_cast %71 : vector<1x16x32xf32> to vector<16x32xf32>
    %73 = arith.truncf %72 : vector<16x32xf32> to vector<16x32xbf16>
    %c0_20 = arith.constant 0 : index
    %c0_21 = arith.constant 0 : index
    %74 = vector.load %arg6[%c0_20, %c0_21] : memref<32x32xbf16, #tpu.memory_space<vmem>>, vector<32x32xbf16>
    %cst_22 = arith.constant dense<0.000000e+00> : vector<16x32xf32>
    %75 = tpu.matmul %73, %74, %cst_22 {dimension_numbers = #tpu.dot_dimension_numbers<[1], [0], [0], [1], [0, 0, 1, 1], [], []>} : vector<16x32xbf16>, vector<32x32xbf16>, vector<16x32xf32> -> vector<16x32xf32>
    %c0_23 = arith.constant 0 : index
    %c0_24 = arith.constant 0 : index
    %76 = vector.load %arg7[%c0_23, %c0_24] : memref<1x32xf32, #tpu.memory_space<vmem>>, vector<1x32xf32>
    %77 = vector.broadcast %76 : vector<1x32xf32> to vector<16x32xf32>
    %78 = arith.addf %75, %77 : vector<16x32xf32>
    %79 = arith.addf %0, %78 : vector<16x32xf32>
    %cst_25 = arith.constant dense<0.000000e+00> : vector<16xf32>
    %80 = vector.multi_reduction <add>, %79, %cst_25 [1] : vector<16x32xf32> to vector<16xf32>
    %81 = vector.shape_cast %80 : vector<16xf32> to vector<16x1xf32>
    %cst_26 = arith.constant 3.200000e+01 : f32
    %82 = vector.broadcast %cst_26 : f32 to vector<16x1xf32>
    %83 = arith.divf %81, %82 : vector<16x1xf32>
    %84 = vector.broadcast %83 : vector<16x1xf32> to vector<16x32xf32>
    %85 = arith.subf %79, %84 : vector<16x32xf32>
    %86 = arith.mulf %85, %85 : vector<16x32xf32>
    %cst_27 = arith.constant dense<0.000000e+00> : vector<16xf32>
    %87 = vector.multi_reduction <add>, %86, %cst_27 [1] : vector<16x32xf32> to vector<16xf32>
    %88 = vector.shape_cast %87 : vector<16xf32> to vector<16x1xf32>
    %cst_28 = arith.constant 3.200000e+01 : f32
    %89 = vector.broadcast %cst_28 : f32 to vector<16x1xf32>
    %90 = arith.divf %88, %89 : vector<16x1xf32>
    %cst_29 = arith.constant 9.99999997E-7 : f32
    %91 = vector.broadcast %cst_29 : f32 to vector<16x1xf32>
    %92 = arith.addf %90, %91 : vector<16x1xf32>
    %93 = math.rsqrt %92 : vector<16x1xf32>
    %94 = vector.broadcast %93 : vector<16x1xf32> to vector<16x32xf32>
    %95 = arith.mulf %85, %94 : vector<16x32xf32>
    %c0_30 = arith.constant 0 : index
    %c0_31 = arith.constant 0 : index
    %96 = vector.load %arg8[%c0_30, %c0_31] : memref<1x32xf32, #tpu.memory_space<vmem>>, vector<1x32xf32>
    %97 = vector.broadcast %96 : vector<1x32xf32> to vector<16x32xf32>
    %98 = arith.mulf %95, %97 : vector<16x32xf32>
    %c0_32 = arith.constant 0 : index
    %c0_33 = arith.constant 0 : index
    %99 = vector.load %arg9[%c0_32, %c0_33] : memref<1x32xf32, #tpu.memory_space<vmem>>, vector<1x32xf32>
    %100 = vector.broadcast %99 : vector<1x32xf32> to vector<16x32xf32>
    %101 = arith.addf %98, %100 : vector<16x32xf32>
    %102 = arith.truncf %101 : vector<16x32xf32> to vector<16x32xbf16>
    %c0_34 = arith.constant 0 : index
    %c0_35 = arith.constant 0 : index
    %103 = vector.load %arg10[%c0_34, %c0_35] : memref<32x128xbf16, #tpu.memory_space<vmem>>, vector<32x128xbf16>
    %cst_36 = arith.constant dense<0.000000e+00> : vector<16x128xf32>
    %104 = tpu.matmul %102, %103, %cst_36 {dimension_numbers = #tpu.dot_dimension_numbers<[1], [0], [0], [1], [0, 0, 1, 1], [], []>} : vector<16x32xbf16>, vector<32x128xbf16>, vector<16x128xf32> -> vector<16x128xf32>
    %c0_37 = arith.constant 0 : index
    %c0_38 = arith.constant 0 : index
    %105 = vector.load %arg11[%c0_37, %c0_38] : memref<1x128xf32, #tpu.memory_space<vmem>>, vector<1x128xf32>
    %106 = vector.broadcast %105 : vector<1x128xf32> to vector<16x128xf32>
    %107 = arith.addf %104, %106 : vector<16x128xf32>
    %cst_39 = arith.constant 5.000000e-01 : f32
    %108 = vector.broadcast %cst_39 : f32 to vector<16x128xf32>
    %109 = arith.mulf %108, %107 : vector<16x128xf32>
    %cst_40 = arith.constant 4.471500e-02 : f32
    %110 = vector.broadcast %cst_40 : f32 to vector<16x128xf32>
    %111 = arith.mulf %110, %107 : vector<16x128xf32>
    %112 = arith.mulf %111, %107 : vector<16x128xf32>
    %113 = arith.mulf %112, %107 : vector<16x128xf32>
    %114 = arith.addf %107, %113 : vector<16x128xf32>
    %cst_41 = arith.constant 0.797884583 : f32
    %115 = vector.broadcast %cst_41 : f32 to vector<16x128xf32>
    %116 = arith.mulf %115, %114 : vector<16x128xf32>
    %117 = math.tanh %116 : vector<16x128xf32>
    %cst_42 = arith.constant 1.000000e+00 : f32
    %118 = vector.broadcast %cst_42 : f32 to vector<16x128xf32>
    %119 = arith.addf %118, %117 : vector<16x128xf32>
    %120 = arith.mulf %109, %119 : vector<16x128xf32>
    %121 = arith.truncf %120 : vector<16x128xf32> to vector<16x128xbf16>
    %c0_43 = arith.constant 0 : index
    %c0_44 = arith.constant 0 : index
    %122 = vector.load %arg12[%c0_43, %c0_44] : memref<128x32xbf16, #tpu.memory_space<vmem>>, vector<128x32xbf16>
    %cst_45 = arith.constant dense<0.000000e+00> : vector<16x32xf32>
    %123 = tpu.matmul %121, %122, %cst_45 {dimension_numbers = #tpu.dot_dimension_numbers<[1], [0], [0], [1], [0, 0, 1, 1], [], []>} : vector<16x128xbf16>, vector<128x32xbf16>, vector<16x32xf32> -> vector<16x32xf32>
    %c0_46 = arith.constant 0 : index
    %c0_47 = arith.constant 0 : index
    %124 = vector.load %arg13[%c0_46, %c0_47] : memref<1x32xf32, #tpu.memory_space<vmem>>, vector<1x32xf32>
    %125 = vector.broadcast %124 : vector<1x32xf32> to vector<16x32xf32>
    %126 = arith.addf %123, %125 : vector<16x32xf32>
    %127 = arith.addf %79, %126 : vector<16x32xf32>
    %c0_48 = arith.constant 0 : index
    %c0_49 = arith.constant 0 : index
    %128 = vector.load %arg14[%c0_48, %c0_49] : memref<16x32xf32, #tpu.memory_space<vmem>>, vector<16x32xf32>
    tpu.vector_store %arg14[%c0_48, %c0_49], %127 {strides = array<i32>} : memref<16x32xf32, #tpu.memory_space<vmem>>, vector<16x32xf32>,
    return
  }
  func.func @transform_0(%arg0: i32) -> (i32, i32) {
    %c0_i32 = arith.constant 0 : i32
    %c0_i32_0 = arith.constant 0 : i32
    return %arg0, %c0_i32 : i32, i32
  }
  func.func @transform_1(%arg0: i32) -> (i32, i32) {
    %c0_i32 = arith.constant 0 : i32
    %c0_i32_0 = arith.constant 0 : i32
    %c0_i32_1 = arith.constant 0 : i32
    return %c0_i32, %c0_i32_0 : i32, i32
  }
  func.func @transform_2(%arg0: i32) -> (i32, i32) {
    %c0_i32 = arith.constant 0 : i32
    %c0_i32_0 = arith.constant 0 : i32
    %c0_i32_1 = arith.constant 0 : i32
    return %c0_i32, %c0_i32_0 : i32, i32
  }
  func.func @transform_3(%arg0: i32) -> (i32, i32) {
    %c0_i32 = arith.constant 0 : i32
    %c0_i32_0 = arith.constant 0 : i32
    %c0_i32_1 = arith.constant 0 : i32
    return %c0_i32, %c0_i32_0 : i32, i32
  }
  func.func @transform_4(%arg0: i32) -> (i32, i32) {
    %c0_i32 = arith.constant 0 : i32
    %c0_i32_0 = arith.constant 0 : i32
    %c0_i32_1 = arith.constant 0 : i32
    return %c0_i32, %c0_i32_0 : i32, i32
  }
  func.func @transform_5(%arg0: i32) -> (i32, i32) {
    %c0_i32 = arith.constant 0 : i32
    %c0_i32_0 = arith.constant 0 : i32
    %c0_i32_1 = arith.constant 0 : i32
    return %c0_i32, %c0_i32_0 : i32, i32
  }
  func.func @transform_6(%arg0: i32) -> (i32, i32) {
    %c0_i32 = arith.constant 0 : i32
    %c0_i32_0 = arith.constant 0 : i32
    %c0_i32_1 = arith.constant 0 : i32
    return %c0_i32, %c0_i32_0 : i32, i32
  }
  func.func @transform_7(%arg0: i32) -> (i32, i32) {
    %c0_i32 = arith.constant 0 : i32
    %c0_i32_0 = arith.constant 0 : i32
    %c0_i32_1 = arith.constant 0 : i32
    return %c0_i32, %c0_i32_0 : i32, i32
  }
  func.func @transform_8(%arg0: i32) -> (i32, i32) {
    %c0_i32 = arith.constant 0 : i32
    %c0_i32_0 = arith.constant 0 : i32
    %c0_i32_1 = arith.constant 0 : i32
    return %c0_i32, %c0_i32_0 : i32, i32
  }
  func.func @transform_9(%arg0: i32) -> (i32, i32) {
    %c0_i32 = arith.constant 0 : i32
    %c0_i32_0 = arith.constant 0 : i32
    %c0_i32_1 = arith.constant 0 : i32
    return %c0_i32, %c0_i32_0 : i32, i32
  }
  func.func @transform_10(%arg0: i32) -> (i32, i32) {
    %c0_i32 = arith.constant 0 : i32
    %c0_i32_0 = arith.constant 0 : i32
    %c0_i32_1 = arith.constant 0 : i32
    return %c0_i32, %c0_i32_0 : i32, i32
  }
  func.func @transform_11(%arg0: i32) -> (i32, i32) {
    %c0_i32 = arith.constant 0 : i32
    %c0_i32_0 = arith.constant 0 : i32
    %c0_i32_1 = arith.constant 0 : i32
    return %c0_i32, %c0_i32_0 : i32, i32
  }
  func.func @transform_12(%arg0: i32) -> (i32, i32) {
    %c0_i32 = arith.constant 0 : i32
    %c0_i32_0 = arith.constant 0 : i32
    %c0_i32_1 = arith.constant 0 : i32
    return %c0_i32, %c0_i32_0 : i32, i32
  }
  func.func @transform_13(%arg0: i32) -> (i32, i32) {
    %c0_i32 = arith.constant 0 : i32
    %c0_i32_0 = arith.constant 0 : i32
    return %arg0, %c0_i32 : i32, i32
  }
}

</mosaic_0001>

<bundles_post_ra>
// kernel: tpu_custom_call.1
= control target key start
LH: loop header
LB: loop body
LE: loop exit
PB: predicated region body
PF: predicated region fallthrough
CT: control target
= control target key end

     0   :  { %s3390_s0 = inlined_call_operand.hbm [shape: f32[32,32], index: 0, kind: input, shape index: {}]   ;;  %s3391_s1 = inlined_call_operand.hbm [shape: f32[1,32], index: 1, kind: input, shape index: {}]   ;;  %s3392_s2 = inlined_call_operand.hbm [shape: f32[1,32], index: 2, kind: input, shape index: {}]   ;;  %s3393_s3 = inlined_call_operand.hbm [shape: bf16[32,96], index: 3, kind: input, shape index: {}]   ;;  %s3394_s4 = inlined_call_operand.hbm [shape: f32[1,96], index: 4, kind: input, shape index: {}]   ;;  %s3395_s5 = inlined_call_operand.hbm [shape: bf16[32,32], index: 5, kind: input, shape index: {}]   ;;  %s3396_s6 = inlined_call_operand.hbm [shape: f32[1,32], index: 6, kind: input, shape index: {}]   ;;  %s3397_s7 = inlined_call_operand.hbm [shape: f32[1,32], index: 7, kind: input, shape index: {}]   ;;  %s3398_s8 = inlined_call_operand.hbm [shape: f32[1,32], index: 8, kind: input, shape index: {}]   ;;  %s3399_s9 = inlined_call_operand.hbm [shape: bf16[32,128], index: 9, kind: input, shape index: {}]   ;;  %s3400_s10 = inlined_call_operand.hbm [shape: f32[1,128], index: 10, kind: input, shape index: {}]   ;;  %s3401_s11 = inlined_call_operand.hbm [shape: bf16[128,32], index: 11, kind: input, shape index: {}]   ;;  %s3402_s12 = inlined_call_operand.hbm [shape: f32[1,32], index: 12, kind: input, shape index: {}]   ;;  %s3403_s13 = inlined_call_operand.hbm [shape: f32[32,32], index: 13, kind: output, shape index: {}]  }
   0x1   :  { %3415 = sst [smem:[#allocation34_spill]] %s3390_s0 }
   0x2   :  { %3416 = sst [smem:[#allocation35_spill]] %s3391_s1 }
   0x3   :  { %3417 = sst [smem:[#allocation36_spill]] %s3393_s3 }
   0x4   :  { %3418 = sst [smem:[#allocation37_spill]] %s3403_s13 }
   0x5   :  { %18 = vsyncpa [#allocation3], 0 }
   0x6   :  { %20 = vsyncpa [#allocation3 + $0x1], 0 }
   0x7   :  { %21 = vsyncpa [#allocation6], 0 }
   0x8   :  { %22 = vsyncpa [#allocation9], 0 }
   0x9   :  { %23 = vsyncpa [#allocation12], 0 }
   0xa   :  { %24 = vsyncpa [#allocation15], 0 }
   0xb   :  { %25 = vsyncpa [#allocation18], 0 }
   0xc   :  { %26 = vsyncpa [#allocation21], 0 }
   0xd   :  { %27 = vsyncpa [#allocation4], 0 }
   0xe   :  { %29 = vsyncpa [#allocation4 + $0x1], 0  ;;  %s2788_s25 = smov 0   ;;  %s2790_s26 = smov 0  }
   0xf   :  { %s2792_s27 = smov 0   ;;  %s2794_s28 = smov 0  }
  0x10 LB: > { %s2688_s29 = smov [#allocation5]   ;;  %s2809_s14 = sadd.s32 4294967295, %s2686_s28   ;;  %s2686_s28 = sphi %s2794_s28, %s3458_s28   ;;  %s2682_s27 = sphi %s2792_s27, %s3457_s27   ;;  %s2678_s26 = sphi %s2790_s26, %s3456_s26   ;;  %s2674_s25 = sphi %s2788_s25, %s3455_s25  }
  0x11   : > { %s357_s30 = sshll.u32 %s2688_s29, 4  ;;  %3419 = sst [smem:[#allocation32_spill]] %s2809_s14  ;;  %s2814_s30 = int_to_ptr.vmem [resolvable:$true] %s357_s30 }
  0x12   : > { %p1776_p0 = scmp.ge.s32.totalorder %s2686_s28, 1  ;;  %p3410_p1 = scmp.eq.s32.totalorder %s2809_s14, 0 }
  0x13   : > { %p344_p2 = scmp.lt.s32.totalorder %s2686_s28, 3  ;;  %s2689_s16 = smov [#allocation8]  }
  0x14   : > { %s378_s17 = sshll.u32 %s2689_s16, 4  ;;  %s2690_s19 = smov [#allocation11]   ;;  %s2823_s17 = int_to_ptr.vmem [resolvable:$true] %s378_s17 }
  0x15   : > { %p2816_p3 = pnand %p1776_p0, %p344_p2  ;;  %s402_s20 = sshll.u32 %s2690_s19, 4  ;;  %s2831_s20 = int_to_ptr.vmem [resolvable:$true] %s402_s20 }
  0x16   : > { %s3423_s1 = sld [smem:[#allocation35_spill]] }
  0x17   : > { %s3420_s15 = scalar_select %p2816_p3, 1, 0 }
  0x18   : > { %p2026_p5 = pneg %p2816_p3 }
  0x19   : > { %3421 = sst [smem:[#allocation33_spill]] %s3420_s15 }
  0x1a   : > { %p2827_p6 = pnand %p2026_p5, %p3410_p1 }
  0x1c   : > { %s2230_s23 = scalar_lea.hbm %s3423_s1, 16  ;;  %p2841_p8 = pneg %p2827_p6 }
  0x1d   : > { %p2231_p7 = scmp.ne.s32.totalorder %s3423_s1, %s2230_s23  ;;  %p2237_p11 = scmp.lt.u32.totalorder %s2230_s23, %s3423_s1 }
  0x1f   : > { %p2233_p9 = pnand %p2841_p8, %p2231_p7 }
  0x21   : > { %p2234_p10 = pneg %p2233_p9 }
  0x23   : > { %p2239_p12 = pnand %p2237_p11, %p2234_p10 }
  0x25   : > { %2242 = shalt.err (!%p2239_p12)
}
  0x26   : > { %s2243_s21 = scalar_lea.vmem %s2814_s30, 16  ;;  %s2250_s22 = scalar_lea.vmem %s2814_s30, 32 }
  0x27   : > { %p2244_p13 = scmp.ne.s32.totalorder %s2814_s30, %s2243_s21  ;;  %p2251_p5 = scmp.lt.s32.totalorder %s2814_s30, %s2814_s30 }
  0x28   : > { %p2252_p7 = scmp.lt.s32.totalorder %s2250_s22, %s2243_s21 }
  0x29   : > { %p2246_p0 = pnand %p2244_p13, %p2841_p8 }
  0x2a   : > { %p2253_p9 = por %p2252_p7, %p2251_p5 }
  0x2b   : > { %p2247_p2 = pneg %p2246_p0 }
  0x2d   : > { %p2254_p4 = pnand %p2253_p9, %p2247_p2 }
  0x2f   : > { %2257 = shalt.err (!%p2254_p4)
}
  0x30   : > { %2029 = dma.hbm_to_vmem [thread:$0]  (!%p2827_p6), %s3423_s1, 16, %s2814_s30, [#allocation6]  }
  0x31   : > { %s3425_s3 = sld [smem:[#allocation36_spill]] }
  0x37   : > { %s2258_s19 = scalar_lea.hbm %s3425_s3, 256 }
  0x38   : > { %p2259_p10 = scmp.ne.s32.totalorder %s3425_s3, %s2258_s19  ;;  %p2265_p4 = scmp.lt.u32.totalorder %s2258_s19, %s3425_s3 }
  0x3a   : > { %p2261_p11 = pnand %p2259_p10, %p2841_p8 }
  0x3c   : > { %p2262_p12 = pneg %p2261_p11 }
  0x3e   : > { %p2267_p13 = pnand %p2265_p4, %p2262_p12 }
  0x40   : > { %2270 = shalt.err (!%p2267_p13)
}
  0x41   : > { %s2271_s30 = scalar_lea.vmem %s2823_s17, 256  ;;  %p2279_p7 = scmp.lt.s32.totalorder %s2823_s17, %s2823_s17 }
  0x42   : > { %p2272_p0 = scmp.ne.s32.totalorder %s2823_s17, %s2271_s30  ;;  %p2280_p9 = scmp.lt.s32.totalorder %s2271_s30, %s2271_s30 }
  0x44   : > { %p2274_p2 = pnand %p2272_p0, %p2841_p8  ;;  %p2281_p10 = por %p2280_p9, %p2279_p7 }
  0x46   : > { %p2275_p5 = pneg %p2274_p2 }
  0x48   : > { %p2282_p11 = pnand %p2281_p10, %p2275_p5 }
  0x4a   : > { %2285 = shalt.err (!%p2282_p11)
}
  0x4b   : > { %s2691_s0 = smov 64   ;;  %s2692_s15 = smov 4  }
  0x4c   : > { %2035 = dma.hbm_to_vmem [thread:$0]  (!%p2827_p6), %s3425_s3, 256, %s2823_s17, [#allocation9], %s2691_s0, %s2691_s0, %s2692_s15  }
  0x4d   : > { %s2286_s19 = scalar_lea.hbm %s3395_s5, 256 }
  0x4e   : > { %p2287_p12 = scmp.ne.s32.totalorder %s3395_s5, %s2286_s19  ;;  %p2293_p0 = scmp.lt.u32.totalorder %s2286_s19, %s3395_s5 }
  0x50   : > { %p2289_p4 = pnand %p2287_p12, %p2841_p8 }
  0x52   : > { %p2290_p13 = pneg %p2289_p4 }
  0x54   : > { %p2295_p2 = pnand %p2293_p0, %p2290_p13 }
  0x56   : > { %2298 = shalt.err (!%p2295_p2)
}
  0x57   : > { %s2299_s17 = scalar_lea.vmem %s2831_s20, 256  ;;  %p2307_p10 = scmp.lt.s32.totalorder %s2831_s20, %s2831_s20 }
  0x58   : > { %p2300_p5 = scmp.ne.s32.totalorder %s2831_s20, %s2299_s17  ;;  %p2308_p11 = scmp.lt.s32.totalorder %s2299_s17, %s2299_s17 }
  0x5a   : > { %p2302_p7 = pnand %p2300_p5, %p2841_p8  ;;  %p2309_p12 = por %p2308_p11, %p2307_p10 }
  0x5c   : > { %p2303_p9 = pneg %p2302_p7 }
  0x5e   : > { %p2310_p4 = pnand %p2309_p12, %p2303_p9 }
  0x60   : > { %2313 = shalt.err (!%p2310_p4)
}
  0x61   : > { %2041 = dma.hbm_to_vmem [thread:$0]  (!%p2827_p6), %s3395_s5, 256, %s2831_s20, [#allocation12], %s2691_s0, %s2691_s0, %s2692_s15  }
  0x62   : > { %s2693_s23 = smov [#allocation14]   ;;  %s2694_s29 = smov [#allocation17]  }
  0x63   : > { %s427_s24 = sshll.u32 %s2693_s23, 4  ;;  %s448_s19 = sshll.u32 %s2694_s29, 4  ;;  %s428_s24 = int_to_ptr.vmem [resolvable:$true] %s427_s24  ;;  %s449_s19 = int_to_ptr.vmem [resolvable:$true] %s448_s19 }
  0x64   : > { %s2314_s30 = scalar_lea.hbm %s3397_s7, 16 }
  0x65   : > { %p2315_p13 = scmp.ne.s32.totalorder %s3397_s7, %s2314_s30  ;;  %p2321_p5 = scmp.lt.u32.totalorder %s2314_s30, %s3397_s7 }
  0x67   : > { %p2317_p0 = pnand %p2315_p13, %p2841_p8 }
  0x69   : > { %p2318_p2 = pneg %p2317_p0 }
  0x6b   : > { %p2323_p7 = pnand %p2321_p5, %p2318_p2 }
  0x6d   : > { %2326 = shalt.err (!%p2323_p7)
}
  0x6e   : > { %s2327_s20 = scalar_lea.vmem %s428_s24, 16  ;;  %s2334_s13 = scalar_lea.vmem %s428_s24, 32 }
  0x6f   : > { %p2328_p9 = scmp.ne.s32.totalorder %s428_s24, %s2327_s20  ;;  %p2335_p12 = scmp.lt.s32.totalorder %s428_s24, %s428_s24 }
  0x70   : > { %p2336_p4 = scmp.lt.s32.totalorder %s2334_s13, %s2327_s20 }
  0x71   : > { %p2330_p10 = pnand %p2328_p9, %p2841_p8 }
  0x72   : > { %p2337_p1 = por %p2336_p4, %p2335_p12 }
  0x73   : > { %p2331_p11 = pneg %p2330_p10 }
  0x75   : > { %p2338_p3 = pnand %p2337_p1, %p2331_p11 }
  0x77   : > { %2341 = shalt.err (!%p2338_p3)
}
  0x78   : > { %2047 = dma.hbm_to_vmem [thread:$0]  (!%p2827_p6), %s3397_s7, 16, %s428_s24, [#allocation15]  }
  0x79   : > { %s2342_s21 = scalar_lea.hbm %s3399_s9, 256 }
  0x7a   : > { %p2343_p13 = scmp.ne.s32.totalorder %s3399_s9, %s2342_s21  ;;  %p2349_p3 = scmp.lt.u32.totalorder %s2342_s21, %s3399_s9 }
  0x7c   : > { %p2345_p0 = pnand %p2343_p13, %p2841_p8 }
  0x7e   : > { %p2346_p1 = pneg %p2345_p0 }
  0x80   : > { %p2351_p2 = pnand %p2349_p3, %p2346_p1 }
  0x82   : > { %2354 = shalt.err (!%p2351_p2)
}
  0x83   : > { %s2355_s20 = scalar_lea.vmem %s449_s19, 256  ;;  %p2363_p10 = scmp.lt.s32.totalorder %s449_s19, %s449_s19 }
  0x84   : > { %p2356_p5 = scmp.ne.s32.totalorder %s449_s19, %s2355_s20  ;;  %p2364_p11 = scmp.lt.s32.totalorder %s2355_s20, %s2355_s20 }
  0x86   : > { %p2358_p7 = pnand %p2356_p5, %p2841_p8  ;;  %p2365_p12 = por %p2364_p11, %p2363_p10 }
  0x88   : > { %p2359_p9 = pneg %p2358_p7 }
  0x8a   : > { %p2366_p4 = pnand %p2365_p12, %p2359_p9 }
  0x8c   : > { %2369 = shalt.err (!%p2366_p4)
}
  0x8d   : > { %2053 = dma.hbm_to_vmem [thread:$0]  (!%p2827_p6), %s3399_s9, 256, %s449_s19, [#allocation18], %s2691_s0, %s2691_s0, %s2692_s15  }
  0x8e   : > { %s2695_s3 = smov [#allocation20]   ;;  %s2696_s14 = smov [#allocation7]  }
  0x8f   : > { %s472_s23 = sshll.u32 %s2695_s3, 4  ;;  %s368_s29 = sshll.u32 %s2696_s14, 4  ;;  %s473_s23 = int_to_ptr.vmem [resolvable:$true] %s472_s23  ;;  %s369_s29 = int_to_ptr.vmem [resolvable:$true] %s368_s29 }
  0x90   : > { %s2370_s30 = scalar_lea.hbm %s3401_s11, 1024 }
  0x91   : > { %p2371_p13 = scmp.ne.s32.totalorder %s3401_s11, %s2370_s30  ;;  %p2377_p3 = scmp.lt.u32.totalorder %s2370_s30, %s3401_s11 }
  0x93   : > { %p2373_p0 = pnand %p2371_p13, %p2841_p8 }
  0x95   : > { %p2374_p1 = pneg %p2373_p0 }
  0x97   : > { %p2379_p2 = pnand %p2377_p3, %p2374_p1 }
  0x99   : > { %2382 = shalt.err (!%p2379_p2)
}
  0x9a   : > { %s2383_s19 = scalar_lea.vmem %s473_s23, 1024  ;;  %p2391_p10 = scmp.lt.s32.totalorder %s473_s23, %s473_s23 }
  0x9b   : > { %p2384_p5 = scmp.ne.s32.totalorder %s473_s23, %s2383_s19  ;;  %p2392_p11 = scmp.lt.s32.totalorder %s2383_s19, %s2383_s19 }
  0x9d   : > { %p2386_p7 = pnand %p2384_p5, %p2841_p8  ;;  %p2393_p12 = por %p2392_p11, %p2391_p10 }
  0x9f   : > { %p2387_p9 = pneg %p2386_p7 }
  0xa1   : > { %p2394_p4 = pnand %p2393_p12, %p2387_p9 }
  0xa3   : > { %2397 = shalt.err (!%p2394_p4)
}
  0xa4   : > { %2059 = dma.hbm_to_vmem [thread:$0]  (!%p2827_p6), %s3401_s11, 1024, %s473_s23, [#allocation21], %s2691_s0, %s2691_s0, %s2692_s15  }
  0xa5   : > { %s2398_s22 = scalar_lea.hbm %s3392_s2, 16 }
  0xa6   : > { %p2399_p13 = scmp.ne.s32.totalorder %s3392_s2, %s2398_s22  ;;  %p2405_p3 = scmp.lt.u32.totalorder %s2398_s22, %s3392_s2 }
  0xa8   : > { %p2401_p0 = pnand %p2399_p13, %p2841_p8 }
  0xaa   : > { %p2402_p1 = pneg %p2401_p0 }
  0xac   : > { %p2407_p2 = pnand %p2405_p3, %p2402_p1 }
  0xae   : > { %2410 = shalt.err (!%p2407_p2)
}
  0xaf   : > { %s2411_s24 = scalar_lea.vmem %s369_s29, 16  ;;  %s2418_s0 = scalar_lea.vmem %s369_s29, 32 }
  0xb0   : > { %p2412_p5 = scmp.ne.s32.totalorder %s369_s29, %s2411_s24  ;;  %p2419_p10 = scmp.lt.s32.totalorder %s369_s29, %s369_s29 }
  0xb1   : > { %p2420_p11 = scmp.lt.s32.totalorder %s2418_s0, %s2411_s24 }
  0xb2   : > { %p2414_p7 = pnand %p2412_p5, %p2841_p8 }
  0xb3   : > { %p2421_p12 = por %p2420_p11, %p2419_p10 }
  0xb4   : > { %p2415_p9 = pneg %p2414_p7 }
  0xb6   : > { %p2422_p4 = pnand %p2421_p12, %p2415_p9 }
  0xb8   : > { %2425 = shalt.err (!%p2422_p4)
}
  0xb9   : > { %2032 = dma.hbm_to_vmem [thread:$0]  (!%p2827_p6), %s3392_s2, 16, %s369_s29, [#allocation6]  }
  0xba   : > { %s2697_s19 = smov [#allocation10]   ;;  %s2698_s3 = smov [#allocation13]  }
  0xbb   : > { %s392_s13 = sshll.u32 %s2697_s19, 4  ;;  %s416_s14 = sshll.u32 %s2698_s3, 4  ;;  %s393_s13 = int_to_ptr.vmem [resolvable:$true] %s392_s13  ;;  %s417_s14 = int_to_ptr.vmem [resolvable:$true] %s416_s14 }
  0xbc   : > { %s2426_s30 = scalar_lea.hbm %s3394_s4, 16 }
  0xbd   : > { %p2427_p13 = scmp.ne.s32.totalorder %s3394_s4, %s2426_s30  ;;  %p2433_p3 = scmp.lt.u32.totalorder %s2426_s30, %s3394_s4 }
  0xbf   : > { %p2429_p0 = pnand %p2427_p13, %p2841_p8 }
  0xc1   : > { %p2430_p1 = pneg %p2429_p0 }
  0xc3   : > { %p2435_p2 = pnand %p2433_p3, %p2430_p1 }
  0xc5   : > { %2438 = shalt.err (!%p2435_p2)
}
  0xc6   : > { %s2439_s29 = scalar_lea.vmem %s393_s13, 16  ;;  %s2446_s0 = scalar_lea.vmem %s393_s13, 32 }
  0xc7   : > { %p2440_p5 = scmp.ne.s32.totalorder %s393_s13, %s2439_s29  ;;  %p2447_p10 = scmp.lt.s32.totalorder %s393_s13, %s393_s13 }
  0xc8   : > { %p2448_p11 = scmp.lt.s32.totalorder %s2446_s0, %s2439_s29 }
  0xc9   : > { %p2442_p7 = pnand %p2440_p5, %p2841_p8 }
  0xca   : > { %p2449_p12 = por %p2448_p11, %p2447_p10 }
  0xcb   : > { %p2443_p9 = pneg %p2442_p7 }
  0xcd   : > { %p2450_p4 = pnand %p2449_p12, %p2443_p9 }
  0xcf   : > { %2453 = shalt.err (!%p2450_p4)
}
  0xd0   : > { %2038 = dma.hbm_to_vmem [thread:$0]  (!%p2827_p6), %s3394_s4, 16, %s393_s13, [#allocation9]  }
  0xd1   : > { %s2454_s21 = scalar_lea.hbm %s3396_s6, 16 }
  0xd2   : > { %p2455_p13 = scmp.ne.s32.totalorder %s3396_s6, %s2454_s21  ;;  %p2461_p3 = scmp.lt.u32.totalorder %s2454_s21, %s3396_s6 }
  0xd4   : > { %p2457_p0 = pnand %p2455_p13, %p2841_p8 }
  0xd6   : > { %p2458_p1 = pneg %p2457_p0 }
  0xd8   : > { %p2463_p2 = pnand %p2461_p3, %p2458_p1 }
  0xda   : > { %2466 = shalt.err (!%p2463_p2)
}
  0xdb   : > { %s2467_s20 = scalar_lea.vmem %s417_s14, 16  ;;  %s2474_s13 = scalar_lea.vmem %s417_s14, 32 }
  0xdc   : > { %p2468_p5 = scmp.ne.s32.totalorder %s417_s14, %s2467_s20  ;;  %p2475_p10 = scmp.lt.s32.totalorder %s417_s14, %s417_s14 }
  0xdd   : > { %p2476_p11 = scmp.lt.s32.totalorder %s2474_s13, %s2467_s20 }
  0xde   : > { %p2470_p7 = pnand %p2468_p5, %p2841_p8 }
  0xdf   : > { %p2477_p12 = por %p2476_p11, %p2475_p10 }
  0xe0   : > { %p2471_p9 = pneg %p2470_p7 }
  0xe2   : > { %p2478_p4 = pnand %p2477_p12, %p2471_p9 }
  0xe4   : > { %2481 = shalt.err (!%p2478_p4)
}
  0xe5   : > { %2044 = dma.hbm_to_vmem [thread:$0]  (!%p2827_p6), %s3396_s6, 16, %s417_s14, [#allocation12]  }
  0xe6   : > { %s2699_s0 = smov [#allocation16]   ;;  %s2700_s23 = smov [#allocation19]  }
  0xe7   : > { %s438_s15 = sshll.u32 %s2699_s0, 4  ;;  %s462_s19 = sshll.u32 %s2700_s23, 4  ;;  %s439_s15 = int_to_ptr.vmem [resolvable:$true] %s438_s15  ;;  %s463_s19 = int_to_ptr.vmem [resolvable:$true] %s462_s19 }
  0xe8   : > { %s2482_s22 = scalar_lea.hbm %s3398_s8, 16 }
  0xe9   : > { %p2483_p13 = scmp.ne.s32.totalorder %s3398_s8, %s2482_s22  ;;  %p2489_p3 = scmp.lt.u32.totalorder %s2482_s22, %s3398_s8 }
  0xeb   : > { %p2485_p0 = pnand %p2483_p13, %p2841_p8 }
  0xed   : > { %p2486_p1 = pneg %p2485_p0 }
  0xef   : > { %p2491_p2 = pnand %p2489_p3, %p2486_p1 }
  0xf1   : > { %2494 = shalt.err (!%p2491_p2)
}
  0xf2   : > { %s2495_s14 = scalar_lea.vmem %s439_s15, 16  ;;  %s2502_s13 = scalar_lea.vmem %s439_s15, 32 }
  0xf3   : > { %p2496_p5 = scmp.ne.s32.totalorder %s439_s15, %s2495_s14  ;;  %p2503_p10 = scmp.lt.s32.totalorder %s439_s15, %s439_s15 }
  0xf4   : > { %p2504_p11 = scmp.lt.s32.totalorder %s2502_s13, %s2495_s14 }
  0xf5   : > { %p2498_p7 = pnand %p2496_p5, %p2841_p8 }
  0xf6   : > { %p2505_p12 = por %p2504_p11, %p2503_p10 }
  0xf7   : > { %p2499_p9 = pneg %p2498_p7 }
  0xf9   : > { %p2506_p4 = pnand %p2505_p12, %p2499_p9 }
  0xfb   : > { %2509 = shalt.err (!%p2506_p4)
}
  0xfc   : > { %2050 = dma.hbm_to_vmem [thread:$0]  (!%p2827_p6), %s3398_s8, 16, %s439_s15, [#allocation15]  }
  0xfd   : > { %s2510_s3 = scalar_lea.hbm %s3400_s10, 16 }
  0xfe   : > { %p2511_p13 = scmp.ne.s32.totalorder %s3400_s10, %s2510_s3  ;;  %p2517_p3 = scmp.lt.u32.totalorder %s2510_s3, %s3400_s10 }
 0x100   : > { %p2513_p0 = pnand %p2511_p13, %p2841_p8 }
 0x102   : > { %p2514_p1 = pneg %p2513_p0 }
 0x104   : > { %p2519_p2 = pnand %p2517_p3, %p2514_p1 }
 0x106   : > { %2522 = shalt.err (!%p2519_p2)
}
 0x107   : > { %s2523_s1 = scalar_lea.vmem %s463_s19, 16  ;;  %s2530_s15 = scalar_lea.vmem %s463_s19, 32 }
 0x108   : > { %p2524_p5 = scmp.ne.s32.totalorder %s463_s19, %s2523_s1  ;;  %p2531_p10 = scmp.lt.s32.totalorder %s463_s19, %s463_s19 }
 0x109   : > { %p2532_p11 = scmp.lt.s32.totalorder %s2530_s15, %s2523_s1 }
 0x10a   : > { %p2526_p7 = pnand %p2524_p5, %p2841_p8 }
 0x10b   : > { %p2533_p12 = por %p2532_p11, %p2531_p10 }
 0x10c   : > { %p2527_p9 = pneg %p2526_p7 }
 0x10e   : > { %p2534_p4 = pnand %p2533_p12, %p2527_p9 }
 0x110   : > { %2537 = shalt.err (!%p2534_p4)
}
 0x111   : > { %2056 = dma.hbm_to_vmem [thread:$0]  (!%p2827_p6), %s3400_s10, 16, %s463_s19, [#allocation18]  }
 0x112   : > { %s2701_s13 = smov [#allocation22]   ;;  %s2538_s23 = scalar_lea.hbm %s3402_s12, 16 }
 0x113   : > { %s486_s24 = sshll.u32 %s2701_s13, 4  ;;  %p2539_p13 = scmp.ne.s32.totalorder %s3402_s12, %s2538_s23  ;;  %s487_s24 = int_to_ptr.vmem [resolvable:$true] %s486_s24 }
 0x114   : > { %p2545_p3 = scmp.lt.u32.totalorder %s2538_s23, %s3402_s12 }
 0x115   : > { %p2541_p0 = pnand %p2539_p13, %p2841_p8 }
 0x117   : > { %p2542_p1 = pneg %p2541_p0 }
 0x119   : > { %p2547_p2 = pnand %p2545_p3, %p2542_p1 }
 0x11b   : > { %2550 = shalt.err (!%p2547_p2)
}
 0x11c   : > { %s2551_s19 = scalar_lea.vmem %s487_s24, 16  ;;  %s2558_s17 = scalar_lea.vmem %s487_s24, 32 }
 0x11d   : > { %p2552_p5 = scmp.ne.s32.totalorder %s487_s24, %s2551_s19  ;;  %p2559_p10 = scmp.lt.s32.totalorder %s487_s24, %s487_s24 }
 0x11e   : > { %p2560_p11 = scmp.lt.s32.totalorder %s2558_s17, %s2551_s19 }
 0x11f   : > { %p2554_p7 = pnand %p2552_p5, %p2841_p8 }
 0x120   : > { %p2561_p12 = por %p2560_p11, %p2559_p10 }
 0x121   : > { %p2555_p9 = pneg %p2554_p7 }
 0x123   : > { %p2562_p4 = pnand %p2561_p12, %p2555_p9 }
 0x125   : > { %2565 = shalt.err (!%p2562_p4)
}
 0x126   : > { %s3426_s16 = sld [smem:[#allocation32_spill]]  ;;  %s1775_s20 = sadd.s32 4294967294, %s2686_s28  }
 0x127   : > { %2062 = dma.hbm_to_vmem [thread:$0]  (!%p2827_p6), %s3402_s12, 16, %s487_s24, [#allocation21]  }
 0x128   : > { %s3085_s18 = sadd.s32 1, %s2686_s28   ;;  %s42_s13 = sadd.s32 1, %s2682_s27 }
 0x129   : > { %s39_s14 = ssub.s32 %s2686_s28, %s3085_s18  ;;  %p49_p13 = scmp.ne.s32.totalorder %s2682_s27, %s2678_s26 }
 0x12a   : > { %p40_p8 = scmp.eq.s32.totalorder %s39_s14, 0  ;;  %p50_p0 = scmp.eq.s32.totalorder %s2686_s28, 0 }
 0x12b   : > { %p55_p1 = scmp.ne.s32.totalorder %s2678_s26, %s2674_s25  ;;  %p337_p7 = scmp.eq.s32.totalorder %s1775_s20, 1 }
 0x12c   : > { %s3096_s29 = scalar_select %p40_p8, %s2682_s27, %s42_s13  }
 0x12d   : > { %p3098_p3 = por %p50_p0, %p49_p13  ;;  %p3428_p2 = scmp.eq.s32.totalorder %s3426_s16, 0 }
 0x12e   : > { %p331_p5 = scmp.eq.s32.totalorder %s3426_s16, 1  ;;  %p2083_p9 = scmp.lt.s32.totalorder %s2686_s28, 2 }
 0x12f   : > { %p3104_p6 = por %p3428_p2, %p55_p1  ;;  %s497_s23 = sand.u32 1, %s2682_s27  }
 0x130   : > { %p3111_p10 = por %p331_p5, %p49_p13  ;;  %p3115_p11 = por %p337_p7, %p55_p1 }
 0x131   : > { %s1790_s22 = sshll.u32 %s497_s23, 4  ;;  %s1846_s30 = sshll.u32 %s2686_s28, 8 }
 0x132   : > { %s3430_s3 = scalar_select %p3111_p10, 1, 0 }
 0x133   : > { %s3431_s21 = scalar_select %p3115_p11, 1, 0 }
 0x134   : > { %s3432_s1 = sld [smem:[#allocation34_spill]]  ;;  %s501_s16 = scalar_lea.vmem [#allocation2], %s1790_s22 }
 0x135   : > { %s508_s20 = sshll.u32 %s501_s16, 4  ;;  %p3129_p12 = pnand %p2083_p9, %p3098_p3  ;;  %s3125_s20 = int_to_ptr.vmem [resolvable:$true] %s508_s20 }
 0x136   : > { %s3133_s13 = scalar_lea.sflag [#allocation3], %s497_s23 }
 0x137   : > { %p2568_p8 = pneg %p3129_p12 }
 0x13a   : > { %s3123_s15 = scalar_lea.hbm %s3432_s1, %s1846_s30  ;;  %s2571_s0 = scalar_lea.hbm %s3432_s1, 512 }
 0x13b   : > { %s2566_s19 = scalar_lea.hbm %s3123_s15, 256  ;;  %p2572_p1 = scmp.lt.u32.totalorder %s3123_s15, %s3432_s1 }
 0x13c   : > { %p2567_p4 = scmp.ne.s32.totalorder %s3123_s15, %s2566_s19  ;;  %p2573_p3 = scmp.lt.u32.totalorder %s2571_s0, %s2566_s19 }
 0x13d   : > { %p2575_p5 = scmp.lt.u32.totalorder %s2566_s19, %s3123_s15 }
 0x13e   : > { %p2569_p13 = pnand %p2568_p8, %p2567_p4  ;;  %p2574_p2 = por %p2573_p3, %p2572_p1 }
 0x140   : > { %p2570_p0 = pneg %p2569_p13  ;;  %p2576_p7 = por %p2575_p5, %p2574_p2 }
 0x142   : > { %p2577_p9 = pnand %p2576_p7, %p2570_p0 }
 0x144   : > { %2580 = shalt.err (!%p2577_p9)
}
 0x145   : > { %s2581_s23 = scalar_lea.vmem %s3125_s20, 256  ;;  %s2702_s22 = smov [#allocation2]  }
 0x146   : > { %p2582_p4 = scmp.ne.s32.totalorder %s3125_s20, %s2581_s23  ;;  %s2586_s30 = sshll.u32 %s2702_s22, 4  ;;  %s2587_s30 = int_to_ptr.vmem [resolvable:$false] %s2586_s30 }
 0x147   : > { %s2588_s17 = scalar_lea.vmem %s2587_s30, 512  ;;  %p2589_p10 = scmp.lt.s32.totalorder %s3125_s20, %s2587_s30 }
 0x148   : > { %p2584_p13 = pnand %p2582_p4, %p2568_p8  ;;  %p2590_p1 = scmp.lt.s32.totalorder %s2588_s17, %s2581_s23 }
 0x14a   : > { %p2585_p11 = pneg %p2584_p13  ;;  %p2591_p3 = por %p2590_p1, %p2589_p10 }
 0x14c   : > { %p2592_p2 = pnand %p2591_p3, %p2585_p11 }
 0x14e   : > { %2595 = shalt.err (!%p2592_p2)
}
 0x14f   : > { %s2703_s19 = smov 128   ;;  %s2704_s0 = smov 8  }
 0x150   : > { %2066 = dma.hbm_to_vmem [thread:$0]  (!%p3129_p12), %s3123_s15, 256, %s3125_s20, %s3133_s13, %s2703_s19, %s2703_s19, %s2704_s0  }
 0x151   : > { %s3434_s16 = sld [smem:[#allocation33_spill]] }
 0x157   : > { %p3435_p8 = scmp.ne.s32.totalorder %s3434_s16, 0 }
 0x158   : > { %s3164_s22 = sand.u32 (!%p3435_p8), 1, %s2678_s26  }
 0x159   : > { %520 = sbr.rel (%p3435_p8) target bundleno = 3044 (0xbe4), region = 72  ;;  %s1794_s23 = sshll.u32 (!%p3435_p8), %s3164_s22, 4 }
 0x15a   : > { %s523_s30 = scalar_lea.sflag (!%p3435_p8), [#allocation3], %s3164_s22  ;;  %s526_s17 = scalar_lea.vmem (!%p3435_p8), [#allocation2], %s1794_s23 }
 0x160   : > { %2641 = dma.done.wait (%p3104_p6), %s523_s30, 256  }
 0x161   : > { %2643 = vsyncadd (%p3104_p6), %s523_s30, 4294967040  ;;  %s3436_s15 = sld [smem:[#allocation32_spill]] }
 0x167   : > { %p3437_p10 = scmp.eq.s32.totalorder %s3436_s15, 0 }
 0x169   : > { %2645 = dma.done.wait (%p3437_p10), [#allocation6], 32   ;;  %p3438_p11 = pmov %p3437_p10 }
 0x16a   : > { %p3439_p12 = pmov %p3437_p10 }
 0x16b   : > { %2647 = vsyncadd (%p3438_p11), [#allocation6], 4294967264 }
 0x16c   : > { %2649 = dma.done.wait (%p3439_p12), [#allocation9], 272   ;;  %p3440_p0 = pmov %p3437_p10 }
 0x16e   : > { %2651 = vsyncadd (%p3440_p0), [#allocation9], 4294967024  ;;  %p3441_p5 = pmov %p3440_p0 }
 0x16f   : > { %p3442_p7 = pmov %p3440_p0 }
 0x170   : > { %2653 = dma.done.wait (%p3441_p5), [#allocation12], 272  }
 0x171   : > { %2655 = vsyncadd (%p3442_p7), [#allocation12], 4294967024  ;;  %p3443_p6 = pmov %p3440_p0 }
 0x172   : > { %p3444_p9 = pmov %p3440_p0 }
 0x173   : > { %2657 = dma.done.wait (%p3443_p6), [#allocation15], 32  }
 0x174   : > { %2659 = vsyncadd (%p3444_p9), [#allocation15], 4294967264  ;;  %p3445_p4 = pmov %p3440_p0 }
 0x175   : > { %p3446_p13 = pmov %p3440_p0 }
 0x176   : > { %2661 = dma.done.wait (%p3445_p4), [#allocation18], 272  }
 0x177   : > { %2663 = vsyncadd (%p3446_p13), [#allocation18], 4294967024  ;;  %p3447_p1 = pmov %p3440_p0 }
 0x178   : > { %p3448_p3 = pmov %p3440_p0 }
 0x179   : > { %2665 = dma.done.wait (%p3447_p1), [#allocation21], 1040  }
 0x17a   : > { %2667 = vsyncadd (%p3448_p3), [#allocation21], 4294966256  ;;  %vm622_vm0 = vcmask 261120   ;;  %v3198_v0 = vld [vmem:[%s526_s17] sm:$0xff]  ;;  %v3200_v1 = vld [vmem:[%s526_s17 + $0x8] sm:$0xff]  ;;  %v2705_v15 = vmov 0.0   ;;  %v744_v53 = vlaneseq }
 0x17b   : > { %v623_v2 = vsel %vm622_vm0, %v3198_v0, 0.0  ;;  %v626_v3 = vsel %vm622_vm0, %v3200_v1, 0.0  ;;  %v2172_v14 = vld [vmem:[#allocation8] sm:$0xff]   ;;  %1882 = vmatprep.subr.bf16.mxu0 %v2705_v15  ;;  %1902 = vmatprep.subr.bf16.mxu1 %v2705_v15  ;;  %v2173_v16 = vld [vmem:[#allocation8 + $0x8] sm:$0xff]   ;;  %vm2706_vm1 = vmmov 0   ;;  %s2707_s24 = smov 112  }
 0x17c   : > { %624 = vadd.xlane.f32.xlu0 %v623_v2  ;;  %1883 = vmatpush3.bf16.msra.mxu0 %v2172_v14  ;;  %v1808_v25 = vld [vmem:[#allocation5] ss:$0 sm:$0xff]  ;;  %v1809_v29 = vld [vmem:[#allocation7] ss:$0 sm:$0xff]  ;;  %v1810_v34 = vld [vmem:[#allocation10] ss:$0 sm:$0xff] }
 0x17d   : > { %1886 = vmatprep.mubr.msk.bf16.mxu0 %vm2706_vm1, %v2705_v15  ;;  %1884 = vmatprep.subr.bf16.mxu0 %v2705_v15  ;;  %s2708_s20 = smov 120   ;;  %s2709_s14 = smov 104   ;;  %vm750_vm2 = vcmask 64512   ;;  %v745_v54 = vand.u32 127, %v744_v53  ;;  %v2711_v55 = vmov -1e+30  }
 0x17e   : > { %1904 = vmatprep.mubr.msk.bf16.mxu1 %vm2706_vm1, %v2705_v15  ;;  %s2710_s13 = smov 96   ;;  %vm945_vm4 = vcmask 130048   ;;  %s2712_s19 = smov 64   ;;  %vm1254_vm5 = vcmask 195584  }
 0x17f   : > { %vm746_vm3 = vcmp.lt.s32.totalorder %v745_v54, 9  ;;  %s3413_s0 = smov 8   ;;  %s2714_s16 = smov 16  }
 0x180   : > { %627 = vadd.xlane.f32.xlu0 %v626_v3  ;;  %1885 = vmatpush3.bf16.msra.mxu0 %v2173_v16  ;;  %v747_v56 = vsel %vm746_vm3, 0.0, %v2711_v55  ;;  %s2715_s30 = smov 24   ;;  %s1847_s17 = sshll.u32 %s3436_s15, 8 }
 0x181   : > { %1890 = vmatprep.subr.bf16.mxu0 %v2705_v15  ;;  %p3450_p8 = scmp.ne.s32.totalorder %s3430_s3, 0 }
 0x209   : > { %v625_v4 = vpop.xlane.xlu0 %624 }
 0x20a   : > { %v630_v5 = vmul.f32 0.03125, %v625_v4 }
 0x20c   : > { %v632_v6 = vsub.f32 %v3198_v0, %v630_v5 }
 0x20d   : > { %v628_v7 = vpop.xlane.xlu0 %627 }
 0x20e   : > { %v631_v8 = vmul.f32 0.03125, %v628_v7  ;;  %v634_v9 = vmul.f32 %v632_v6, %v632_v6 }
 0x210   : > { %v633_v10 = vsub.f32 %v3200_v1, %v631_v8  ;;  %v636_v11 = vsel %vm622_vm0, %v634_v9, 0.0 }
 0x211   : > { %637 = vadd.xlane.f32.xlu1 %v636_v11 }
 0x212   : > { %v635_v12 = vmul.f32 %v633_v10, %v633_v10 }
 0x214   : > { %v639_v13 = vsel %vm622_vm0, %v635_v12, 0.0 }
 0x215   : > { %640 = vadd.xlane.f32.xlu1 %v639_v13 }
 0x29e   : > { %v638_v17 = vpop.xlane.xlu1 %637 }
 0x29f   : > { %v642_v18 = vmul.f32 0.03125, %v638_v17 }
 0x2a1   : > { %v644_v19 = vadd.f32 1e-06, %v642_v18 }
 0x2a2   : > { %v641_v20 = vpop.xlane.xlu1 %640 }
 0x2a3   : > { %2186 = vrsqrt.f32 %v644_v19  ;;  %v643_v21 = vmul.f32 0.03125, %v641_v20 }
 0x2a5   : > { %v645_v22 = vadd.f32 1e-06, %v643_v21 }
 0x2a7   : > { %2188 = vrsqrt.f32 %v645_v22 }
 0x2ad   : > { %v2187_v23 = vpop.eup %2186 }
 0x2ae   : > { %v648_v24 = vmul.f32 %v2187_v23, %v632_v6 }
 0x2b0   : > { %v657_v28 = vmul.f32 %v1808_v25, %v648_v24 }
 0x2b1   : > { %v2189_v26 = vpop.eup %2188 }
 0x2b2   : > { %v649_v27 = vmul.f32 %v2189_v26, %v633_v10  ;;  %v666_v31 = vadd.f32 %v1809_v29, %v657_v28 }
 0x2b4   : > { %v658_v30 = vmul.f32 %v1808_v25, %v649_v27 }
 0x2b6   : > { %v667_v32 = vadd.f32 %v1809_v29, %v658_v30 }
 0x2b8   : > { %v668_v33 = vpack.c.bf16 %v667_v32, %v666_v31 }
 0x2ba   : > { %1887 = vmatmul.mubr.msk.bf16.vlgmr.msra.gmra.mrb[0].mxu0 %vm622_vm0, %v668_v33 }
 0x2bb   : > { %1892 = vmatprep.mubr.msk.bf16.mxu0 %vm2706_vm1, %v2705_v15 }
 0x38d   : > { %v729_v35 = vpop.f32.mrb[0].mxu0 }
 0x38e   : > { %v1888_v36 = vpop.f32.mrb[1].mxu0  ;;  %v730_v38 = vadd.f32 %v1810_v34, %v729_v35 }
 0x38f   : > { %v732_v37 = vpop.f32.mrb[2].mxu0 }
 0x390   : > { %v733_v39 = vadd.f32 %v1810_v34, %v732_v37  ;;  %v1889_v40 = vpop.f32.mrb[3].mxu0 }
 0x392   : > { %v3221_v41 = vpack.c.bf16 %v733_v39, %v730_v38 }
 0x394   : > { %740 = vrot.lane.b32.xlu1 %v3221_v41, %s2707_s24  ;;  %738 = vrot.lane.b32.xlu0 %v3221_v41, %s2708_s20  ;;  %s616_s24 = scalar_lea.vmem [#allocation23], %s1794_s23 }
 0x395   : > { %s1588_s20 = sshll.u32 %s616_s24, 4  ;;  %s3344_s20 = int_to_ptr.vmem [resolvable:$true] %s1588_s20 }
 0x396   : > { %s2596_s15 = scalar_lea.vmem %s3344_s20, 256 }
 0x397   : > { %p2597_p2 = scmp.ne.s32.totalorder %s3344_s20, %s2596_s15 }
 0x398   : > { %742 = vrot.lane.b32.xlu1 %v3221_v41, %s2709_s14 }
 0x399   : > { %p2598_p10 = pnand %p2597_p2, %p3450_p8 }
 0x39b   : > { %p2599_p11 = pneg %p2598_p10 }
 0x39c   : > { %748 = vrot.lane.b32.xlu1 %v3221_v41, %s2710_s13 }
 0x406   : > { %v3227_v42 = vpop.permute.xlu1 %740  ;;  %v3229_v43 = vpop.permute.xlu0 %738 }
 0x407   : > { %847 = vrot.lane.b32.xlu1 %v3227_v42, %s2710_s13  ;;  %798 = vrot.lane.b32.xlu0 %v3229_v43, %s2710_s13 }
 0x40a   : > { %v3233_v44 = vpop.permute.xlu1 %742 }
 0x40b   : > { %896 = vrot.lane.b32.xlu0 %v3233_v44, %s2710_s13 }
 0x40e   : > { %v749_v45 = vpop.permute.xlu1 %748 }
 0x40f   : > { %v755_v46 = vsel %vm750_vm2, %v749_v45, 0 }
 0x410   : > { %1891 = vmatpush3.bf16.xpose.msra.mxu0 %v755_v46 }
 0x411   : > { %1896 = vmatprep.subr.bf16.mxu0 %v2705_v15 }
 0x417   : > { %1893 = vmatmul.mubr.msk.bf16.vlgmr.msra.gmra.mrb[4].mxu0 %vm750_vm2, %v3221_v41 }
 0x418   : > { %1898 = vmatprep.mubr.msk.bf16.mxu0 %vm2706_vm1, %v2705_v15 }
 0x479   : > { %v848_v47 = vpop.permute.xlu1 %847  ;;  %v799_v48 = vpop.permute.xlu0 %798 }
 0x47a   : > { %v804_v49 = vsel %vm750_vm2, %v799_v48, 0  ;;  %v853_v50 = vsel %vm750_vm2, %v848_v47, 0 }
 0x47b   : > { %1897 = vmatpush3.bf16.xpose.msra.mxu0 %v804_v49  ;;  %1903 = vmatpush3.bf16.xpose.msra.mxu1 %v853_v50 }
 0x47c   : > { %1908 = vmatprep.subr.bf16.mxu0 %v2705_v15  ;;  %1914 = vmatprep.subr.bf16.mxu1 %v2705_v15 }
 0x47d   : > { %v897_v51 = vpop.permute.xlu0 %896 }
 0x47e   : > { %v902_v52 = vsel %vm750_vm2, %v897_v51, 0 }
 0x482   : > { %1899 = vmatmul.mubr.msk.bf16.vlgmr.msra.gmra.mrb[8].mxu0 %vm750_vm2, %v3229_v43  ;;  %1905 = vmatmul.mubr.msk.bf16.vlgmr.msra.gmra.mrb[0].mxu1 %vm750_vm2, %v3227_v42 }
 0x483   : > { %1909 = vmatpush3.bf16.xpose.msra.mxu0 %v902_v52  ;;  %1910 = vmatprep.mubr.msk.bf16.mxu0 %vm2706_vm1, %v2705_v15 }
 0x484   : > { %1916 = vmatprep.mubr.msk.bf16.mxu1 %vm2706_vm1, %v2705_v15  ;;  %1920 = vmatprep.subr.bf16.mxu0 %v2705_v15 }
 0x48a   : > { %1911 = vmatmul.mubr.msk.bf16.vlgmr.msra.gmra.mrb[12].mxu0 %vm750_vm2, %v3233_v44 }
 0x48b   : > { %1922 = vmatprep.mubr.msk.bf16.mxu0 %vm2706_vm1, %v2705_v15 }
 0x4ea   : > { %v791_v57 = vpop.f32.mrb[4].mxu0 }
 0x4eb   : > { %v792_v58 = vadd.f32 %v791_v57, %v747_v56  ;;  %v1894_v59 = vpop.f32.mrb[5].mxu0 }
 0x4ec   : > { %v794_v60 = vpop.f32.mrb[6].mxu0 }
 0x4ed   : > { %v795_v61 = vadd.f32 %v794_v60, %v747_v56  ;;  %v1895_v62 = vpop.f32.mrb[7].mxu0  ;;  %v946_v63 = vsel %vm945_vm4, %v792_v58, -inf }
 0x4ee   : > { %947 = vmax.xlane.f32.xlu1 %v946_v63 }
 0x4ef   : > { %v949_v2 = vsel %vm945_vm4, %v795_v61, -inf }
 0x4f0   : > { %950 = vmax.xlane.f32.xlu0 %v949_v2 }
 0x555   : > { %v840_v3 = vpop.f32.mrb[8].mxu0  ;;  %v889_v4 = vpop.f32.mrb[0].mxu1 }
 0x556   : > { %v841_v5 = vadd.f32 %v840_v3, %v747_v56  ;;  %v890_v6 = vadd.f32 %v889_v4, %v747_v56  ;;  %v1900_v7 = vpop.f32.mrb[9].mxu0  ;;  %v1906_v8 = vpop.f32.mrb[1].mxu1 }
 0x557   : > { %v843_v9 = vpop.f32.mrb[10].mxu0  ;;  %v892_v10 = vpop.f32.mrb[2].mxu1 }
 0x558   : > { %v844_v11 = vadd.f32 %v843_v9, %v747_v56  ;;  %v1901_v12 = vpop.f32.mrb[11].mxu0  ;;  %v1907_v13 = vpop.f32.mrb[3].mxu1  ;;  %v958_v14 = vsel %vm945_vm4, %v890_v6, -inf  ;;  %v952_v16 = vsel %vm945_vm4, %v841_v5, -inf  ;;  %v893_v17 = vadd.f32 %v892_v10, %v747_v56 }
 0x559   : > { %959 = vmax.xlane.f32.xlu1 %v958_v14  ;;  %953 = vmax.xlane.f32.xlu0 %v952_v16 }
 0x55a   : > { %v955_v18 = vsel %vm945_vm4, %v844_v11, -inf  ;;  %v961_v25 = vsel %vm945_vm4, %v893_v17, -inf }
 0x55d   : > { %956 = vmax.xlane.f32.xlu0 %v955_v18  ;;  %v938_v19 = vpop.f32.mrb[12].mxu0 }
 0x55e   : > { %v939_v20 = vadd.f32 %v938_v19, %v747_v56  ;;  %v1912_v21 = vpop.f32.mrb[13].mxu0 }
 0x55f   : > { %v941_v22 = vpop.f32.mrb[14].mxu0 }
 0x560   : > { %v942_v23 = vadd.f32 %v941_v22, %v747_v56  ;;  %v1913_v24 = vpop.f32.mrb[15].mxu0  ;;  %v964_v26 = vsel %vm945_vm4, %v939_v20, -inf }
 0x561   : > { %962 = vmax.xlane.f32.xlu0 %v961_v25  ;;  %965 = vmax.xlane.f32.xlu1 %v964_v26 }
 0x562   : > { %v967_v27 = vsel %vm945_vm4, %v942_v23, -inf }
 0x565   : > { %968 = vmax.xlane.f32.xlu0 %v967_v27 }
 0x572   : > { %1038 = vrot.lane.b32.xlu1 %v3221_v41, %s2712_s19 }
 0x57b   : > { %v948_v28 = vpop.xlane.xlu1 %947 }
 0x57c   : > { %v970_v31 = vsub.f32 %v792_v58, %v948_v28 }
 0x57d   : > { %v951_v29 = vpop.xlane.xlu0 %950 }
 0x57e   : > { %v971_v30 = vsub.f32 %v795_v61, %v951_v29  ;;  %v978_v33 = vmul.f32 1.442695, %v970_v31 }
 0x580   : > { %v980_v32 = vmul.f32 1.442695, %v971_v30 }
 0x582   : > { %2190 = vpow2.f32 %v980_v32 }
 0x583   : > { %2192 = vpow2.f32 %v978_v33 }
 0x58c   : > { %v2191_v34 = vpop.eup %2190 }
 0x58d   : > { %v997_v35 = vsel %vm945_vm4, %v2191_v34, 0.0  ;;  %v2193_v36 = vpop.eup %2192 }
 0x58e   : > { %998 = vadd.xlane.f32.xlu0 %v997_v35  ;;  %v994_v37 = vsel %vm945_vm4, %v2193_v36, 0.0 }
 0x596   : > { %995 = vadd.xlane.f32.xlu1 %v994_v37 }
 0x5e6   : > { %v960_v38 = vpop.xlane.xlu1 %959  ;;  %v954_v39 = vpop.xlane.xlu0 %953 }
 0x5e7   : > { %v974_v40 = vsub.f32 %v890_v6, %v960_v38  ;;  %v972_v41 = vsub.f32 %v841_v5, %v954_v39 }
 0x5e9   : > { %v982_v45 = vmul.f32 1.442695, %v972_v41  ;;  %v986_v46 = vmul.f32 1.442695, %v974_v40 }
 0x5ea   : > { %v957_v47 = vpop.xlane.xlu0 %956 }
 0x5eb   : > { %v973_v48 = vsub.f32 %v844_v11, %v957_v47  ;;  %2194 = vpow2.f32 %v982_v45 }
 0x5ec   : > { %2196 = vpow2.f32 %v986_v46  ;;  %v2174_v46 = vld [vmem:[#allocation11] sm:$0xff]  }
 0x5ed   : > { %v984_v49 = vmul.f32 1.442695, %v973_v48 }
 0x5ee   : > { %v963_v50 = vpop.xlane.xlu0 %962  ;;  %v966_v51 = vpop.xlane.xlu1 %965 }
 0x5ef   : > { %2198 = vpow2.f32 %v984_v49  ;;  %v975_v52 = vsub.f32 %v893_v17, %v963_v50  ;;  %v976_v53 = vsub.f32 %v939_v20, %v966_v51  ;;  %v2175_v49 = vld [vmem:[#allocation11 + $0x8] sm:$0xff]  }
 0x5f1   : > { %v988_v54 = vmul.f32 1.442695, %v975_v52  ;;  %v990_v55 = vmul.f32 1.442695, %v976_v53 }
 0x5f2   : > { %v1039_v56 = vpop.permute.xlu1 %1038  ;;  %v969_v57 = vpop.xlane.xlu0 %968 }
 0x5f3   : > { %2200 = vpow2.f32 %v988_v54  ;;  %v977_v58 = vsub.f32 %v942_v23, %v969_v57  ;;  %1915 = vmatpush3.bf16.msra.mxu1 %v1039_v56 }
 0x5f4   : > { %2202 = vpow2.f32 %v990_v55  ;;  %1926 = vmatprep.subr.bf16.mxu1 %v2705_v15 }
 0x5f5   : > { %v992_v59 = vmul.f32 1.442695, %v977_v58  ;;  %v2195_v60 = vpop.eup %2194 }
 0x5f6   : > { %v1000_v61 = vsel %vm945_vm4, %v2195_v60, 0.0  ;;  %v2197_v62 = vpop.eup %2196 }
 0x5f7   : > { %2204 = vpow2.f32 %v992_v59  ;;  %1001 = vadd.xlane.f32.xlu1 %v1000_v61  ;;  %v1006_v3 = vsel %vm945_vm4, %v2197_v62, 0.0 }
 0x5f9   : > { %v2199_v63 = vpop.eup %2198 }
 0x5fa   : > { %v1003_v2 = vsel %vm945_vm4, %v2199_v63, 0.0 }
 0x5fb   : > { %1004 = vadd.xlane.f32.xlu0 %v1003_v2  ;;  %1007 = vadd.xlane.f32.xlu1 %v1006_v3 }
 0x5fd   : > { %v2201_v4 = vpop.eup %2200 }
 0x5fe   : > { %v2203_v5 = vpop.eup %2202  ;;  %v1009_v6 = vsel %vm945_vm4, %v2201_v4, 0.0 }
 0x5ff   : > { %v1012_v7 = vsel %vm945_vm4, %v2203_v5, 0.0  ;;  %1010 = vadd.xlane.f32.xlu0 %v1009_v6 }
 0x600   : > { %1013 = vadd.xlane.f32.xlu1 %v1012_v7 }
 0x601   : > { %v2205_v8 = vpop.eup %2204 }
 0x602   : > { %v1015_v9 = vsel %vm945_vm4, %v2205_v8, 0.0 }
 0x603   : > { %1016 = vadd.xlane.f32.xlu0 %v1015_v9 }
 0x611   : > { %1132 = vrot.lane.b32.xlu1 %v3227_v42, %s2712_s19 }
 0x615   : > { %1179 = vrot.lane.b32.xlu1 %v3233_v44, %s2712_s19 }
 0x619   : > { %1085 = vrot.lane.b32.xlu0 %v3229_v43, %s2712_s19  ;;  %s3449_s19 = sld [smem:[#allocation37_spill]] }
 0x61b   : > { %v999_v10 = vpop.xlane.xlu0 %998 }
 0x61c   : > { %2206 = vrcp.f32 %v999_v10 }
 0x623   : > { %v996_v11 = vpop.xlane.xlu1 %995 }
 0x624   : > { %2208 = vrcp.f32 %v996_v11 }
 0x626   : > { %v2207_v12 = vpop.eup %2206 }
 0x627   : > { %v1027_v14 = vmul.f32 %v2207_v12, %v2191_v34 }
 0x62e   : > { %v2209_v13 = vpop.eup %2208 }
 0x62f   : > { %v1026_v16 = vmul.f32 %v2209_v13, %v2193_v36 }
 0x631   : > { %v1034_v17 = vpack.c.bf16 %v1027_v14, %v1026_v16 }
 0x633   : > { %1917 = vmatmul.mubr.msk.bf16.vlgmr.msra.gmra.mrb[4].mxu1 %vm945_vm4, %v1034_v17 }
 0x634   : > { %1928 = vmatprep.mubr.msk.bf16.mxu1 %vm2706_vm1, %v2705_v15 }
 0x684   : > { %v1002_v42 = vpop.xlane.xlu1 %1001 }
 0x685   : > { %2210 = vrcp.f32 %v1002_v42  ;;  %v1822_v42 = vld [vmem:[#allocation13] ss:$0 sm:$0xff] }
 0x688   : > { %v1005_v44 = vpop.xlane.xlu0 %1004  ;;  %v1008_v18 = vpop.xlane.xlu1 %1007 }
 0x689   : > { %2212 = vrcp.f32 %v1005_v44 }
 0x68a   : > { %2214 = vrcp.f32 %v1008_v18 }
 0x68c   : > { %v1011_v43 = vpop.xlane.xlu0 %1010 }
 0x68d   : > { %v1014_v19 = vpop.xlane.xlu1 %1013  ;;  %2216 = vrcp.f32 %v1011_v43 }
 0x68e   : > { %2218 = vrcp.f32 %v1014_v19 }
 0x68f   : > { %v2211_v21 = vpop.eup %2210 }
 0x690   : > { %v1017_v20 = vpop.xlane.xlu0 %1016  ;;  %v1028_v24 = vmul.f32 %v2211_v21, %v2195_v60 }
 0x691   : > { %v1133_v22 = vpop.permute.xlu1 %1132  ;;  %2220 = vrcp.f32 %v1017_v20 }
 0x692   : > { %1927 = vmatpush3.bf16.msra.mxu1 %v1133_v22 }
 0x693   : > { %v2213_v23 = vpop.eup %2212  ;;  %1938 = vmatprep.subr.bf16.mxu1 %v2705_v15 }
 0x694   : > { %v1029_v25 = vmul.f32 %v2213_v23, %v2199_v63  ;;  %v1086_v26 = vpop.permute.xlu0 %1085  ;;  %v2215_v27 = vpop.eup %2214 }
 0x695   : > { %1921 = vmatpush3.bf16.msra.mxu0 %v1086_v26  ;;  %v1030_v30 = vmul.f32 %v2215_v27, %v2197_v62  ;;  %v1180_v32 = vpop.permute.xlu1 %1179 }
 0x696   : > { %v1035_v28 = vpack.c.bf16 %v1029_v25, %v1028_v24  ;;  %1932 = vmatprep.subr.bf16.mxu0 %v2705_v15 }
 0x697   : > { %v2217_v29 = vpop.eup %2216 }
 0x698   : > { %v1031_v31 = vmul.f32 %v2217_v29, %v2201_v4  ;;  %1923 = vmatmul.mubr.msk.bf16.vlgmr.msra.gmra.mrb[16].mxu0 %vm945_vm4, %v1035_v28  ;;  %v2219_v33 = vpop.eup %2218 }
 0x699   : > { %1933 = vmatpush3.bf16.msra.mxu0 %v1180_v32  ;;  %1934 = vmatprep.mubr.msk.bf16.mxu0 %vm2706_vm1, %v2705_v15  ;;  %v1032_v36 = vmul.f32 %v2219_v33, %v2203_v5 }
 0x69a   : > { %v1036_v34 = vpack.c.bf16 %v1031_v31, %v1030_v30  ;;  %1946 = vmatprep.subr.bf16.mxu0 %v2705_v15 }
 0x69b   : > { %v2221_v35 = vpop.eup %2220 }
 0x69c   : > { %v1033_v37 = vmul.f32 %v2221_v35, %v2205_v8  ;;  %1929 = vmatmul.mubr.msk.bf16.vlgmr.msra.gmra.mrb[8].mxu1 %vm945_vm4, %v1036_v34  ;;  %v2176_v34 = vld [vmem:[#allocation17] sm:$0xff]   ;;  %v2177_v35 = vld [vmem:[#allocation17 + $0x8] sm:$0xff]  }
 0x69d   : > { %1942 = vmatprep.mubr.msk.bf16.mxu1 %vm2706_vm1, %v2705_v15  ;;  %1939 = vmatpush3.bf16.msra.mxu1 %v2174_v46 }
 0x69e   : > { %v1037_v38 = vpack.c.bf16 %v1033_v37, %v1032_v36  ;;  %1940 = vmatprep.subr.bf16.mxu1 %v2705_v15 }
 0x6a0   : > { %1935 = vmatmul.mubr.msk.bf16.vlgmr.msra.gmra.mrb[20].mxu0 %vm945_vm4, %v1037_v38 }
 0x6a1   : > { %1950 = vmatprep.mubr.msk.bf16.mxu0 %vm2706_vm1, %v2705_v15  ;;  %1941 = vmatpush3.bf16.msra.mxu1 %v2175_v49 }
 0x6a2   : > { %1954 = vmatprep.subr.bf16.mxu1 %v2705_v15  ;;  %1947 = vmatpush3.bf16.msra.mxu0 %v2176_v34 }
 0x6a3   : > { %1948 = vmatprep.subr.bf16.mxu0 %v2705_v15 }
 0x6a6   : > { %1949 = vmatpush3.bf16.msra.mxu0 %v2177_v35 }
 0x706   : > { %v1078_v39 = vpop.f32.mrb[4].mxu1 }
 0x707   : > { %v1918_v40 = vpop.f32.mrb[5].mxu1 }
 0x708   : > { %v1081_v41 = vpop.f32.mrb[6].mxu1 }
 0x709   : > { %v1919_v45 = vpop.f32.mrb[7].mxu1 }
 0x76b   : > { %v1125_v47 = vpop.f32.mrb[16].mxu0 }
 0x76c   : > { %v1924_v48 = vpop.f32.mrb[17].mxu0 }
 0x76d   : > { %v1128_v50 = vpop.f32.mrb[18].mxu0 }
 0x76e   : > { %v2157_v51 = vpack.i.bf16 %v1128_v50, %v1125_v47  ;;  %v1925_v52 = vpop.f32.mrb[19].mxu0  ;;  %v1826_v47 = vld [vmem:[#allocation14] ss:$0 sm:$0xff] }
 0x76f   : > { %v1172_v53 = vpop.f32.mrb[8].mxu1 }
 0x770   : > { %v1930_v54 = vpop.f32.mrb[9].mxu1  ;;  %2158 = vrot.lane.b32.xlu1 %v2157_v51, %s3413_s0  ;;  %v1827_v51 = vld [vmem:[#allocation16] ss:$0 sm:$0xff] }
 0x771   : > { %v1175_v55 = vpop.f32.mrb[10].mxu1 }
 0x772   : > { %v2162_v56 = vpack.i.bf16 %v1175_v55, %v1172_v53  ;;  %v1931_v57 = vpop.f32.mrb[11].mxu1 }
 0x773   : > { %v1219_v58 = vpop.f32.mrb[20].mxu0  ;;  %v2179_v57 = vld [vmem:[#allocation20 + $0x8] sm:$0xff]  }
 0x774   : > { %2163 = vrot.lane.b32.xlu0 %v2162_v56, %s2714_s16  ;;  %v1936_v59 = vpop.f32.mrb[21].mxu0  ;;  %v2178_v56 = vld [vmem:[#allocation20] sm:$0xff]   ;;  %s3340_s16 = scalar_lea.hbm %s3449_s19, %s1847_s17 }
 0x775   : > { %v1222_v60 = vpop.f32.mrb[22].mxu0  ;;  %v2181_v59 = vld [vmem:[#allocation20 + $0x18] sm:$0xff]  }
 0x776   : > { %v2167_v61 = vpack.i.bf16 %v1222_v60, %v1219_v58  ;;  %v1937_v62 = vpop.f32.mrb[23].mxu0  ;;  %v2180_v58 = vld [vmem:[#allocation20 + $0x10] sm:$0xff]   ;;  %v2182_v60 = vld [vmem:[#allocation20 + $0x20] sm:$0xff]  }
 0x777   : > { %v2184_v62 = vld [vmem:[#allocation20 + $0x30] sm:$0xff]  }
 0x778   : > { %2168 = vrot.lane.b32.xlu1 %v2167_v61, %s2715_s30  ;;  %v2183_v61 = vld [vmem:[#allocation20 + $0x28] sm:$0xff]   ;;  %s2716_s30 = smov [#allocation23]  }
 0x779   : > { %s2600_s17 = sshll.u32 %s2716_s30, 4  ;;  %s2601_s17 = int_to_ptr.vmem [resolvable:$false] %s2600_s17 }
 0x77a   : > { %s2602_s14 = scalar_lea.vmem %s2601_s17, 512  ;;  %p2603_p12 = scmp.lt.s32.totalorder %s3344_s20, %s2601_s17 }
 0x77b   : > { %p2604_p0 = scmp.lt.s32.totalorder %s2602_s14, %s2596_s15 }
 0x77d   : > { %p2605_p5 = por %p2604_p0, %p2603_p12 }
 0x77f   : > { %p2606_p7 = pnand %p2605_p5, %p2599_p11 }
 0x7e2   : > { %v2159_v63 = vpop.permute.xlu1 %2158 }
 0x7e3   : > { %v2161_v3 = vunpack.i.h.bf16 %v2159_v63  ;;  %v2160_v4 = vunpack.i.l.bf16 %v2159_v63  ;;  %v2185_v63 = vld [vmem:[#allocation20 + $0x38] sm:$0xff]  }
 0x7e5   : > { %v1251_v8 = vsel %vm750_vm2, %v1081_v41, %v2161_v3  ;;  %v1250_v9 = vsel %vm750_vm2, %v1078_v39, %v2160_v4 }
 0x7e6   : > { %v2164_v2 = vpop.permute.xlu0 %2163 }
 0x7e7   : > { %v2166_v5 = vunpack.i.h.bf16 %v2164_v2  ;;  %v2165_v6 = vunpack.i.l.bf16 %v2164_v2  ;;  %v1828_v2 = vld [vmem:[#allocation19] ss:$0 sm:$0xff] }
 0x7e9   : > { %v1252_v12 = vsel %vm945_vm4, %v1250_v9, %v2165_v6  ;;  %v1253_v13 = vsel %vm945_vm4, %v1251_v8, %v2166_v5 }
 0x7ea   : > { %v2169_v7 = vpop.permute.xlu1 %2168 }
 0x7eb   : > { %v2171_v10 = vunpack.i.h.bf16 %v2169_v7  ;;  %v2170_v11 = vunpack.i.l.bf16 %v2169_v7 }
 0x7ed   : > { %v1256_v14 = vsel %vm1254_vm5, %v1253_v13, %v2171_v10  ;;  %v1255_v16 = vsel %vm1254_vm5, %v1252_v12, %v2170_v11 }
 0x7ee   : > { %v1257_v17 = vpack.c.bf16 %v1256_v14, %v1255_v16 }
 0x7f0   : > { %1943 = vmatmul.mubr.msk.bf16.vlgmr.msra.gmra.mrb[12].mxu1 %vm622_vm0, %v1257_v17 }
 0x7f1   : > { %1970 = vmatprep.mubr.msk.bf16.mxu1 %vm2706_vm1, %v2705_v15  ;;  %1955 = vmatpush3.bf16.msra.mxu1 %v2178_v56 }
 0x7f2   : > { %1956 = vmatprep.subr.bf16.mxu1 %v2705_v15 }
 0x7f5   : > { %1957 = vmatpush3.bf16.msra.mxu1 %v2179_v57 }
 0x7f6   : > { %1958 = vmatprep.subr.bf16.mxu1 %v2705_v15 }
 0x7f9   : > { %1959 = vmatpush3.bf16.msra.mxu1 %v2180_v58 }
 0x7fa   : > { %1960 = vmatprep.subr.bf16.mxu1 %v2705_v15 }
 0x7fd   : > { %1961 = vmatpush3.bf16.msra.mxu1 %v2181_v59 }
 0x7fe   : > { %1962 = vmatprep.subr.bf16.mxu1 %v2705_v15 }
 0x801   : > { %1963 = vmatpush3.bf16.msra.mxu1 %v2182_v60 }
 0x802   : > { %1964 = vmatprep.subr.bf16.mxu1 %v2705_v15 }
 0x805   : > { %1965 = vmatpush3.bf16.msra.mxu1 %v2183_v61 }
 0x806   : > { %1966 = vmatprep.subr.bf16.mxu1 %v2705_v15 }
 0x809   : > { %1967 = vmatpush3.bf16.msra.mxu1 %v2184_v62 }
 0x80a   : > { %1968 = vmatprep.subr.bf16.mxu1 %v2705_v15 }
 0x80d   : > { %1969 = vmatpush3.bf16.msra.mxu1 %v2185_v63 }
 0x8c3   : > { %v1318_v44 = vpop.f32.mrb[12].mxu1 }
 0x8c4   : > { %v1319_v18 = vadd.f32 %v1822_v42, %v1318_v44  ;;  %v1944_v43 = vpop.f32.mrb[13].mxu1 }
 0x8c5   : > { %v1321_v19 = vpop.f32.mrb[14].mxu1 }
 0x8c6   : > { %v3311_v20 = vadd.f32 %v1319_v18, %v3198_v0  ;;  %v1322_v21 = vadd.f32 %v1822_v42, %v1321_v19  ;;  %v1945_v22 = vpop.f32.mrb[15].mxu1 }
 0x8c8   : > { %v3314_v23 = vadd.f32 %v1322_v21, %v3200_v1  ;;  %v1327_v24 = vsel %vm622_vm0, %v3311_v20, 0.0 }
 0x8c9   : > { %1328 = vadd.xlane.f32.xlu0 %v1327_v24 }
 0x8ca   : > { %v1330_v25 = vsel %vm622_vm0, %v3314_v23, 0.0 }
 0x8cb   : > { %1331 = vadd.xlane.f32.xlu1 %v1330_v25 }
 0x956   : > { %v1329_v26 = vpop.xlane.xlu0 %1328 }
 0x957   : > { %v1333_v27 = vmul.f32 0.03125, %v1329_v26 }
 0x958   : > { %v1332_v28 = vpop.xlane.xlu1 %1331 }
 0x959   : > { %v1335_v29 = vsub.f32 %v3311_v20, %v1333_v27  ;;  %v1334_v0 = vmul.f32 0.03125, %v1332_v28  ;;  %v1832_v27 = vld [vmem:[#allocation22] ss:$0 sm:$0xff] }
 0x95b   : > { %v1336_v30 = vsub.f32 %v3314_v23, %v1334_v0  ;;  %v1337_v31 = vmul.f32 %v1335_v29, %v1335_v29 }
 0x95d   : > { %v1339_v1 = vsel %vm622_vm0, %v1337_v31, 0.0  ;;  %v1338_v32 = vmul.f32 %v1336_v30, %v1336_v30 }
 0x95e   : > { %1340 = vadd.xlane.f32.xlu0 %v1339_v1 }
 0x95f   : > { %v1342_v33 = vsel %vm622_vm0, %v1338_v32, 0.0 }
 0x962   : > { %1343 = vadd.xlane.f32.xlu0 %v1342_v33 }
 0x9eb   : > { %v1341_v36 = vpop.xlane.xlu0 %1340 }
 0x9ec   : > { %v1345_v37 = vmul.f32 0.03125, %v1341_v36 }
 0x9ee   : > { %v1347_v38 = vadd.f32 1e-06, %v1345_v37 }
 0x9ef   : > { %v1344_v39 = vpop.xlane.xlu0 %1343 }
 0x9f0   : > { %2222 = vrsqrt.f32 %v1347_v38  ;;  %v1346_v40 = vmul.f32 0.03125, %v1344_v39 }
 0x9f2   : > { %v1348_v41 = vadd.f32 1e-06, %v1346_v40 }
 0x9f4   : > { %2224 = vrsqrt.f32 %v1348_v41 }
 0x9fa   : > { %v2223_v45 = vpop.eup %2222 }
 0x9fb   : > { %v1351_v46 = vmul.f32 %v2223_v45, %v1335_v29 }
 0x9fd   : > { %v1360_v49 = vmul.f32 %v1826_v47, %v1351_v46 }
 0x9fe   : > { %v2225_v48 = vpop.eup %2224 }
 0x9ff   : > { %v1352_v50 = vmul.f32 %v2225_v48, %v1336_v30  ;;  %v1369_v53 = vadd.f32 %v1827_v51, %v1360_v49 }
 0xa01   : > { %v1361_v52 = vmul.f32 %v1826_v47, %v1352_v50 }
 0xa03   : > { %v1370_v54 = vadd.f32 %v1827_v51, %v1361_v52 }
 0xa05   : > { %v1371_v55 = vpack.c.bf16 %v1370_v54, %v1369_v53 }
 0xa07   : > { %1951 = vmatmul.mubr.msk.bf16.vlgmr.msra.gmra.mrb[24].mxu0 %vm622_vm0, %v1371_v55 }
 0xada   : > { %v1432_v3 = vpop.f32.mrb[24].mxu0 }
 0xadb   : > { %v1433_v4 = vadd.f32 %v1828_v2, %v1432_v3  ;;  %v1952_v5 = vpop.f32.mrb[25].mxu0 }
 0xadc   : > { %v1435_v6 = vpop.f32.mrb[26].mxu0 }
 0xadd   : > { %v1441_v7 = vmul.f32 0.044715, %v1433_v4  ;;  %v1436_v8 = vadd.f32 %v1828_v2, %v1435_v6  ;;  %v1953_v9 = vpop.f32.mrb[27].mxu0  ;;  %v1439_v19 = vmul.f32 0.5, %v1433_v4 }
 0xadf   : > { %v1443_v10 = vmul.f32 %v1441_v7, %v1433_v4  ;;  %v1442_v11 = vmul.f32 0.044715, %v1436_v8  ;;  %v1440_v21 = vmul.f32 0.5, %v1436_v8 }
 0xae1   : > { %v1445_v12 = vmul.f32 %v1443_v10, %v1433_v4  ;;  %v1444_v13 = vmul.f32 %v1442_v11, %v1436_v8 }
 0xae3   : > { %v1447_v14 = vadd.f32 %v1445_v12, %v1433_v4  ;;  %v1446_v16 = vmul.f32 %v1444_v13, %v1436_v8 }
 0xae5   : > { %v1449_v17 = vmul.f32 0.7978846, %v1447_v14  ;;  %v1448_v42 = vadd.f32 %v1446_v16, %v1436_v8 }
 0xae7   : > { %2226 = vtanh.f32 %v1449_v17  ;;  %v1450_v44 = vmul.f32 0.7978846, %v1448_v42 }
 0xae9   : > { %2228 = vtanh.f32 %v1450_v44 }
 0xaf1   : > { %v2227_v15 = vpop.eup %2226 }
 0xaf2   : > { %v1453_v18 = vadd.f32 1.0, %v2227_v15 }
 0xaf3   : > { %v2229_v43 = vpop.eup %2228 }
 0xaf4   : > { %v1454_v22 = vadd.f32 1.0, %v2229_v43  ;;  %v1455_v24 = vmul.f32 %v1453_v18, %v1439_v19 }
 0xaf6   : > { %v1456_v25 = vmul.f32 %v1454_v22, %v1440_v21 }
 0xaf8   : > { %v1457_v26 = vpack.c.bf16 %v1456_v25, %v1455_v24 }
 0xafa   : > { %1971 = vmatmul.mubr.bf16.vlgmr.msra.gmra.mrb[16].mxu1 %v1457_v26 }
 0xbcd   : > { %v1563_v28 = vpop.f32.mrb[16].mxu1 }
 0xbce   : > { %v1564_v29 = vadd.f32 %v1832_v27, %v1563_v28  ;;  %v1972_v0 = vpop.f32.mrb[17].mxu1 }
 0xbcf   : > { %v1566_v30 = vpop.f32.mrb[18].mxu1 }
 0xbd0   : > { %v1570_v31 = vadd.f32 %v1564_v29, %v3311_v20  ;;  %v1567_v1 = vadd.f32 %v1832_v27, %v1566_v30  ;;  %v1973_v32 = vpop.f32.mrb[19].mxu1 }
 0xbd2   : > { %1572 = vst.msk [vmem:[%s616_s24] sm:$0xff] %vm622_vm0, %v1570_v31  ;;  %v1571_v33 = vadd.f32 %v1567_v1, %v3314_v23 }
 0xbd4   : > { %1573 = vst.msk [vmem:[%s616_s24 + $0x8] sm:$0xff] %vm622_vm0, %v1571_v33 }
 0xbd5   : > { %2609 = shalt.err (!%p2606_p7)
}
 0xbd6   : > { %s2610_s24 = scalar_lea.hbm %s3340_s16, 256  ;;  %s2614_s30 = scalar_lea.hbm %s3449_s19, 512 }
 0xbd7   : > { %p2611_p6 = scmp.ne.s32.totalorder %s3340_s16, %s2610_s24  ;;  %p2615_p13 = scmp.lt.u32.totalorder %s3340_s16, %s3449_s19 }
 0xbd8   : > { %p2616_p1 = scmp.lt.u32.totalorder %s2614_s30, %s2610_s24  ;;  %p2618_p2 = scmp.lt.u32.totalorder %s2610_s24, %s3340_s16 }
 0xbd9   : > { %p2612_p9 = pnand %p2611_p6, %p3450_p8 }
 0xbda   : > { %p2617_p3 = por %p2616_p1, %p2615_p13 }
 0xbdb   : > { %p2613_p4 = pneg %p2612_p9 }
 0xbdc   : > { %p2619_p10 = por %p2618_p2, %p2617_p3 }
 0xbde   : > { %p2620_p11 = pnand %p2619_p10, %p2613_p4 }
 0xbe0   : > { %2623 = shalt.err (!%p2620_p11)
}
 0xbe1   : > { %s2717_s15 = smov 128   ;;  %s3451_s14 = smov 8  }
 0xbe2   : > { %s3452_s1 = scalar_lea.sflag [#allocation4], %s3164_s22 }
 0xbe3   : > { %2024 = dma.vmem_to_hbm [thread:$0]  (%p3450_p8), %s3344_s20, 256, %s3340_s16, %s3452_s1, %s2717_s15, %s2717_s15, %s3451_s14  }
 0xbe4 PF: > { %s1603_s0 = sand.u32 1, %s2674_s25   ;;  %p3453_p12 = scmp.ne.s32.totalorder %s3431_s21, 0 }
 0xbe5   : > { %p3454_p0 = scmp.ge.s32.totalorder %s2686_s28, 2  ;;  %s1604_s23 = scalar_lea.sflag [#allocation4], %s1603_s0 }
 0xbe7   : > { %p2068_p5 = pnand %p3454_p0, %p3453_p12 }
 0xbe9   : > { %2669 = dma.done.wait (!%p2068_p5), %s1604_s23, 256  }
 0xbea   : > { %2671 = vsyncadd (!%p2068_p5), %s1604_s23, 4294967040  ;;  %p32_p7 = scmp.ge.s32.totalorder %s3085_s18, 4   ;;  %s3455_s25 = smov %s2678_s26 }
 0xbeb   : > { %s3456_s26 = smov %s2682_s27  ;;  %s3457_s27 = smov %s3096_s29 }
 0xbec   : > { %s3458_s28 = smov %s3085_s18  ;;  %34 = sbr.rel (!%p32_p7) target bundleno = 16 (0x10), region = 165 }
 0xbf3   :  { %1609 = vsyncpa [#allocation3], 1 }
 0xbf4   :  { %1611 = vsyncpa [#allocation3 + $0x1], 1 }
 0xbf5   :  { %1612 = vsyncpa [#allocation6], 1 }
 0xbf6   :  { %1613 = vsyncpa [#allocation9], 1 }
 0xbf7   :  { %1614 = vsyncpa [#allocation12], 1 }
 0xbf8   :  { %1615 = vsyncpa [#allocation15], 1 }
 0xbf9   :  { %1616 = vsyncpa [#allocation18], 1 }
 0xbfa   :  { %1617 = vsyncpa [#allocation21], 1 }
 0xbfb   :  { %1618 = vsyncpa [#allocation4], 1 }
 0xbfc   :  { %1620 = vsyncpa [#allocation4 + $0x1], 1 }

</bundles_post_ra>
